<compile_context>
chip_gen: v5e
topology: v5e:2x2
jax: 0.10.0
libtpu: 0.0.40
codegen_flags: <defaults>
</compile_context>

<pallas_src>
import functools

import numpy as np
import jax
import jax.numpy as jnp
from jax.experimental import pallas as pl
from jax.experimental.pallas import tpu as pltpu

# Operand dtype for every MXU matmul (accumulation is always f32).  bf16 is the native MXU
# dtype on v5e/v6e/v7x; set to jnp.float32 to recover exact f32 semantics for debugging.
MATMUL_DTYPE = jnp.bfloat16
# Adjacency masks are {0,1}; shipping them compactly halves their DMA/VMEM footprint.
MASK_DTYPE = jnp.bfloat16


def _round_up(x, m):
    return ((x + m - 1) // m) * m


# ----------------------------------------------------------------------------
# Fused kernel
# ----------------------------------------------------------------------------
def _fusion_kernel(kn_ref, ex_ref,
                   adj_d_ref, adj_u_ref, adj_ek_ref,
                   wt_d_ref, wt_u_ref, wt_ek_ref,
                   csrc_ref, expack_ref, bias_ref,
                   exer_out_ref, kn_out_ref,
                   *, col_u, col_fb, col_fa):
    f32 = jnp.float32
    kn = kn_ref[...]                                   # [Kp, Dp] f32
    ex = ex_ref[...]                                   # [Ep, Dp] f32
    kn_m = kn.astype(MATMUL_DTYPE)
    ex_m = ex.astype(MATMUL_DTYPE)

    # Src-side attention terms of all three GATs in ONE NT matmul:
    #   v_all[r, j] = csrc_r . kn[j]   with csrc_r = W_r^T a_src_r (input space).
    v_all = jax.lax.dot_general(
        csrc_ref[...], kn_m,
        dimension_numbers=(((1,), (1,)), ((), ())),
        preferred_element_type=f32)                    # [16, Kp]

    def masked_softmax(s, mask):
        # DGL mailbox softmax over incoming edges; zero-in-degree rows stay all-zero.
        s = jnp.where(mask, s, -1e30)
        m = jnp.max(s, axis=-1, keepdims=True)
        p = jnp.where(mask, jnp.exp(s - m), 0.0)
        denom = jnp.sum(p, axis=-1, keepdims=True)
        inv = jnp.where(denom > 0.0, pl.reciprocal(denom, approx=True), 0.0)
        return p * inv

    def knowledge_gat(wt_ref, adj_ref, v_row):
        # z carries the folded columns: col_u = z.a_dst, col_fb = z.w_fuse_b, col_fa = h.w_fuse_a
        z = jnp.dot(kn_m, wt_ref[...], preferred_element_type=f32)       # [Kp, Dp]
        s = z[:, col_u:col_u + 1] + v_row                                # [Kp, Kp] outer sum
        alpha = masked_softmax(s, adj_ref[...] > 0.0)
        agg = jnp.dot(alpha.astype(MATMUL_DTYPE), z.astype(MATMUL_DTYPE),
                      preferred_element_type=f32)                        # [Kp, Dp]
        # agg[:, col_fb] == (GAT output) @ w_fuse_b ;  z[:, col_fa] == kn @ w_fuse_a
        return agg, z[:, col_fa:col_fa + 1]

    k_dir, kn_wk1a = knowledge_gat(wt_d_ref, adj_d_ref, v_all[0:1, :])
    k_und, kn_wk2a = knowledge_gat(wt_u_ref, adj_u_ref, v_all[1:2, :])

    # --- e_from_k GAT in bipartite form: knowledge sources -> exercise destinations ------
    z_ek = jnp.dot(kn_m, wt_ek_ref[...], preferred_element_type=f32)     # [Kp, Dp]
    exu = jnp.dot(ex_m, expack_ref[...], preferred_element_type=f32)     # [Ep, 128]
    s_ek = exu[:, 0:1] + v_all[2:3, :]                                   # [Ep, Kp]
    alpha_ek = masked_softmax(s_ek, adj_ek_ref[...] > 0.0)
    b_e = jnp.dot(alpha_ek.astype(MATMUL_DTYPE), z_ek.astype(MATMUL_DTYPE),
                  preferred_element_type=f32)                            # [Ep, Dp]

    # --- knowledge fusion head: 2-way softmax gate ---------------------------------------
    s1 = kn_wk1a + k_dir[:, col_fb:col_fb + 1] + bias_ref[0]
    s2 = kn_wk2a + k_und[:, col_fb:col_fb + 1] + bias_ref[1]
    mm = jnp.maximum(s1, s2)
    p1 = jnp.exp(s1 - mm)
    p2 = jnp.exp(s2 - mm)
    inv12 = pl.reciprocal(p1 + p2, approx=True)
    kn_out_ref[...] = kn + (p1 * inv12) * k_dir + (p2 * inv12) * k_und

    # --- exercise fusion head: raw (non-softmax) gate ------------------------------------
    s_e = exu[:, 1:2] + b_e[:, col_fb:col_fb + 1] + bias_ref[2]
    exer_out_ref[...] = ex + s_e * b_e


# ----------------------------------------------------------------------------
# One-time host-side packing (hoisted out of the per-forward path).
# ----------------------------------------------------------------------------
def prepare_fusion(params, adj_directed, adj_undirected, adj_e_from_k):
    f32 = jnp.float32
    W_d = jnp.asarray(params["W_d"], f32)
    D = W_d.shape[1]
    K = adj_directed.shape[0]
    E = adj_e_from_k.shape[0] - K

    Dp = _round_up(D, 128)
    if Dp - D < 3:               # need 3 spare lane columns for the folded vectors
        Dp += 128
    Kp = _round_up(K, 8)
    Ep = _round_up(E, 8)
    col_u, col_fb, col_fa = Dp - 1, Dp - 2, Dp - 3

    def pad2(x, rows, cols, dtype):
        x = jnp.asarray(x, f32)
        return jnp.pad(x, ((0, rows - x.shape[0]), (0, cols - x.shape[1]))).astype(dtype)

    adj_d_p = pad2(adj_directed, Kp, Kp, MASK_DTYPE)
    adj_u_p = pad2(adj_undirected, Kp, Kp, MASK_DTYPE)
    # TODO(synk): the DisenGCD e_from_k graph only has knowledge->exercise edges, so only
    # the [exercise_dst, knowledge_src] block of its adjacency is used (bipartite form).
    adj_ek_p = pad2(jnp.asarray(adj_e_from_k, f32)[:E, E:], Ep, Kp, MASK_DTYPE)

    def vec(v):
        return jnp.asarray(v, f32).reshape(-1)

    wk1, wk2, we1 = vec(params["wk1"]), vec(params["wk2"]), vec(params["we1"])

    def make_wt(W, a, w_fuse_b, w_fuse_a):
        W = jnp.asarray(W, f32)                      # torch Linear layout [out, in]
        a = vec(a)
        a_src, a_dst = a[:D], a[D:]
        Wt = jnp.zeros((Dp, Dp), f32).at[:D, :D].set(W.T)
        Wt = Wt.at[:D, col_u].set(W.T @ a_dst)       # -> z . a_dst
        Wt = Wt.at[:D, col_fb].set(W.T @ w_fuse_b)   # -> (alpha @ z) . w_fuse_b
        if w_fuse_a is not None:
            Wt = Wt.at[:D, col_fa].set(w_fuse_a)     # -> h . w_fuse_a
        csrc = W.T @ a_src                           # z . a_src folded to input space
        return Wt.astype(MATMUL_DTYPE), csrc

    wt_d, csrc_d = make_wt(params["W_d"], params["a_d"], wk1[D:], wk1[:D])
    wt_u, csrc_u = make_wt(params["W_u"], params["a_u"], wk2[D:], wk2[:D])
    wt_ek, csrc_ek = make_wt(params["W_ek"], params["a_ek"], we1[D:], None)

    csrc_all = jnp.zeros((16, Dp), f32)
    csrc_all = (csrc_all.at[0, :D].set(csrc_d)
                        .at[1, :D].set(csrc_u)
                        .at[2, :D].set(csrc_ek)).astype(MATMUL_DTYPE)

    a_ek = vec(params["a_ek"])
    ex_pack = jnp.zeros((Dp, 128), f32)
    ex_pack = ex_pack.at[:D, 0].set(jnp.asarray(params["W_ek"], f32).T @ a_ek[D:])  # dst attn
    ex_pack = ex_pack.at[:D, 1].set(we1[:D])                                        # e_attn_fc1
    ex_pack = ex_pack.astype(MATMUL_DTYPE)

    biases = jnp.stack([jnp.asarray(params["bk1"], f32).reshape(()),
                        jnp.asarray(params["bk2"], f32).reshape(()),
                        jnp.asarray(params["be1"], f32).reshape(())]).astype(f32)

    dims = dict(E=E, K=K, D=D, Ep=Ep, Kp=Kp, Dp=Dp,
                col_u=col_u, col_fb=col_fb, col_fa=col_fa)
    arrays = dict(adj_d=adj_d_p, adj_u=adj_u_p, adj_ek=adj_ek_p,
                  wt_d=wt_d, wt_u=wt_u, wt_ek=wt_ek,
                  csrc_all=csrc_all, ex_pack=ex_pack, biases=biases)
    return dims, arrays


def make_fusion_forward(dims, arrays):
    E, K, D = dims["E"], dims["K"], dims["D"]
    Ep, Kp, Dp = dims["Ep"], dims["Kp"], dims["Dp"]
    f32 = jnp.float32

    kernel = functools.partial(_fusion_kernel, col_u=dims["col_u"],
                               col_fb=dims["col_fb"], col_fa=dims["col_fa"])

    vmem = pl.BlockSpec(memory_space=pltpu.MemorySpace.VMEM)
    smem = pl.BlockSpec(memory_space=pltpu.MemorySpace.SMEM)

    static_inputs = (arrays["adj_d"], arrays["adj_u"], arrays["adj_ek"],
                     arrays["wt_d"], arrays["wt_u"], arrays["wt_ek"],
                     arrays["csrc_all"], arrays["ex_pack"], arrays["biases"])

    # Advisory cost estimate for XLA scheduling.
    def mm(m, k, n):
        return 2 * m * k * n
    flops = (mm(16, Dp, Kp) + 3 * mm(Kp, Dp, Dp) + 2 * mm(Kp, Kp, Dp)
             + mm(Ep, Dp, 128) + mm(Ep, Kp, Dp)
             + 12 * Kp * Kp + 8 * Ep * Kp + 10 * Kp * Dp + 6 * Ep * Dp)
    trans = 2 * Kp * Kp + Ep * Kp + 5 * Kp + Ep
    static_bytes = sum(int(np.prod(a.shape)) * a.dtype.itemsize for a in static_inputs)
    feat_bytes = (Kp + Ep) * Dp * 4 * 2        # padded feature inputs + outputs
    bytes_accessed = static_bytes + feat_bytes
    cost = pl.CostEstimate(flops=int(flops), transcendentals=int(trans),
                           bytes_accessed=int(bytes_accessed))

    # VMEM budget derived from the actual working set (operands + score/alpha intermediates),
    # instead of a blanket constant; headroom x3, clamped to [16 MiB, 100 MiB].
    work = bytes_accessed + 6 * max(Kp * Kp, Ep * Kp) * 4 + 6 * Kp * Dp * 4
    vmem_limit = int(min(100 * 2 ** 20, max(16 * 2 ** 20, 3 * work)))

    call = pl.pallas_call(
        kernel,
        out_shape=(jax.ShapeDtypeStruct((Ep, Dp), f32),
                   jax.ShapeDtypeStruct((Kp, Dp), f32)),
        in_specs=[vmem] * 10 + [smem],
        out_specs=(vmem, vmem),
        compiler_params=pltpu.CompilerParams(vmem_limit_bytes=vmem_limit),
        cost_estimate=cost,
    )

    def forward(exer_emb, kn_emb):
        kn_p = jnp.pad(kn_emb.astype(f32), ((0, Kp - K), (0, Dp - D)))
        ex_p = jnp.pad(exer_emb.astype(f32), ((0, Ep - E), (0, Dp - D)))
        exer_out_p, kn_out_p = call(
            kn_p, ex_p,
            arrays["adj_d"], arrays["adj_u"], arrays["adj_ek"],
            arrays["wt_d"], arrays["wt_u"], arrays["wt_ek"],
            arrays["csrc_all"], arrays["ex_pack"], arrays["biases"])
        return exer_out_p[:E, :D], kn_out_p[:K, :D]

    return jax.jit(forward)


# ----------------------------------------------------------------------------
# Pure-JAX f32 reference (dense formulation of the module semantics) — sanity check only.
# ----------------------------------------------------------------------------
def _gat_ref(h, adj, W, a):
    Dm = W.shape[0]
    z = h @ W.T
    a_src, a_dst = a[:Dm], a[Dm:]
    s = (z @ a_dst)[:, None] + (z @ a_src)[None, :]
    s = jnp.where(adj > 0, s, jnp.float32(-1e30))
    p = jnp.exp(s - jnp.max(s, axis=-1, keepdims=True)) * adj
    denom = jnp.sum(p, axis=-1, keepdims=True)
    alpha = jnp.where(denom > 0, p / jnp.where(denom > 0, denom, 1.0), 0.0)
    return alpha @ z


def fusion_reference(exer_emb, kn_emb, adj_d, adj_u, adj_ek, params):
    k_dir = _gat_ref(kn_emb, adj_d, params["W_d"], params["a_d"])
    k_und = _gat_ref(kn_emb, adj_u, params["W_u"], params["a_u"])
    ek = jnp.concatenate([exer_emb, kn_emb], axis=0)
    ek_out = _gat_ref(ek, adj_ek, params["W_ek"], params["a_ek"])

    A, B, C = kn_emb, k_dir, k_und
    s1 = jnp.concatenate([A, B], 1) @ params["wk1"].reshape(-1) + params["bk1"]
    s2 = jnp.concatenate([A, C], 1) @ params["wk2"].reshape(-1) + params["bk2"]
    sc = jax.nn.softmax(jnp.stack([s1, s2], axis=1), axis=1)
    kn_out = A + sc[:, 0:1] * B + sc[:, 1:2] * C

    E = exer_emb.shape[0]
    Ae, Be = exer_emb, ek_out[:E]
    se = jnp.concatenate([Ae, Be], 1) @ params["we1"].reshape(-1) + params["be1"]
    exer_out = Ae + se[:, None] * Be
    return exer_out, kn_out


# ----------------------------------------------------------------------------
if __name__ == "__main__":
    # Small shapes consistent with the module (knowledge_dim == knowledge_num).
    K = 60            # knowledge_num (also feature dim) -> padded to (64, 128)
    E = 30            # exercise_num                     -> padded to 32 rows
    D = K

    f32 = jnp.float32
    keys = jax.random.split(jax.random.PRNGKey(0), 16)

    kn_emb = jax.random.normal(keys[0], (K, D), f32)
    exer_emb = jax.random.normal(keys[1], (E, D), f32)

    # Dense adjacency masks adj[dst, src] = 1 iff edge src -> dst.  Self-loops keep
    # in-degree >= 1 on the knowledge graphs so the mailbox softmax is well defined.
    eyeK = jnp.eye(K, dtype=f32)
    adj_d = jnp.maximum((jax.random.uniform(keys[2], (K, K)) < 0.15).astype(f32), eyeK)
    half = (jax.random.uniform(keys[3], (K, K)) < 0.10).astype(f32)
    adj_u = jnp.maximum(jnp.clip(half + half.T, 0.0, 1.0), eyeK)

    # e_from_k graph over E+K nodes: exercises (rows 0..E-1) receive from knowledge nodes.
    ek_mask = (jax.random.uniform(keys[4], (E, K)) < 0.2).astype(f32)
    ek_mask = ek_mask.at[jnp.arange(E), jnp.arange(E) % K].set(1.0)
    adj_ek = jnp.zeros((E + K, E + K), f32).at[:E, E:].set(ek_mask)

    def lin(key, shape, scale):
        return scale * jax.random.normal(key, shape, f32)

    params = {
        "W_d":  lin(keys[5],  (D, D), 1.0 / np.sqrt(D)),
        "a_d":  lin(keys[6],  (2 * D,), 1.0 / np.sqrt(2 * D)),
        "W_u":  lin(keys[7],  (D, D), 1.0 / np.sqrt(D)),
        "a_u":  lin(keys[8],  (2 * D,), 1.0 / np.sqrt(2 * D)),
        "W_ek": lin(keys[9],  (D, D), 1.0 / np.sqrt(D)),
        "a_ek": lin(keys[10], (2 * D,), 1.0 / np.sqrt(2 * D)),
        "wk1":  lin(keys[11], (1, 2 * D), 0.1),
        "bk1":  lin(keys[12], (), 0.1),
        "wk2":  lin(keys[13], (1, 2 * D), 0.1),
        "bk2":  lin(keys[14], (), 0.1),
        "we1":  lin(keys[15], (1, 2 * D), 0.1),
        "be1":  jnp.asarray(0.05, f32),
    }

    dims, arrays = prepare_fusion(params, adj_d, adj_u, adj_ek)   # one-time packing
    fusion = make_fusion_forward(dims, arrays)

    exer_out, kn_out = jax.block_until_ready(fusion(exer_emb, kn_emb))

    ref_ex, ref_kn = fusion_reference(exer_emb, kn_emb, adj_d, adj_u, adj_ek, params)
    # Tolerances account for bf16 matmul operands (f32 accumulation) in the kernel.
    np.testing.assert_allclose(np.asarray(exer_out), np.asarray(ref_ex), atol=5e-2, rtol=5e-2)
    np.testing.assert_allclose(np.asarray(kn_out), np.asarray(ref_kn), atol=5e-2, rtol=5e-2)

    print("KERNEL_OK")
</pallas_src>

<mosaic_0001>
module attributes {stable_mosaic.version = 11 : i64} {
  func.func @_fusion_kernel(%arg0: memref<64x128xf32, #tpu.memory_space<vmem>>, %arg1: memref<32x128xf32, #tpu.memory_space<vmem>>, %arg2: memref<64x64xbf16, #tpu.memory_space<vmem>>, %arg3: memref<64x64xbf16, #tpu.memory_space<vmem>>, %arg4: memref<32x64xbf16, #tpu.memory_space<vmem>>, %arg5: memref<128x128xbf16, #tpu.memory_space<vmem>>, %arg6: memref<128x128xbf16, #tpu.memory_space<vmem>>, %arg7: memref<128x128xbf16, #tpu.memory_space<vmem>>, %arg8: memref<16x128xbf16, #tpu.memory_space<vmem>>, %arg9: memref<128x128xbf16, #tpu.memory_space<vmem>>, %arg10: memref<3xf32, #tpu.memory_space<smem>>, %arg11: memref<32x128xf32, #tpu.memory_space<vmem>>, %arg12: memref<64x128xf32, #tpu.memory_space<vmem>>) attributes {dimension_semantics = [], scalar_prefetch = 0 : i64, scratch_operands = 0 : i64, tpu.core_type = #tpu.core_type<tc>} {
    %c0 = arith.constant 0 : index
    %c0_0 = arith.constant 0 : index
    %0 = vector.load %arg0[%c0, %c0_0] : memref<64x128xf32, #tpu.memory_space<vmem>>, vector<64x128xf32>
    %c0_1 = arith.constant 0 : index
    %c0_2 = arith.constant 0 : index
    %1 = vector.load %arg1[%c0_1, %c0_2] : memref<32x128xf32, #tpu.memory_space<vmem>>, vector<32x128xf32>
    %2 = arith.truncf %0 : vector<64x128xf32> to vector<64x128xbf16>
    %3 = arith.truncf %1 : vector<32x128xf32> to vector<32x128xbf16>
    %c0_3 = arith.constant 0 : index
    %c0_4 = arith.constant 0 : index
    %4 = vector.load %arg8[%c0_3, %c0_4] : memref<16x128xbf16, #tpu.memory_space<vmem>>, vector<16x128xbf16>
    %cst = arith.constant dense<0.000000e+00> : vector<16x64xf32>
    %5 = tpu.matmul %4, %2, %cst {dimension_numbers = #tpu.dot_dimension_numbers<[1], [1], [0], [0], [0, 0, 1, 0], [], []>} : vector<16x128xbf16>, vector<64x128xbf16>, vector<16x64xf32> -> vector<16x64xf32>
    %6 = vector.extract_strided_slice %5 {offsets = [0, 0], sizes = [1, 64], strides = [1, 1]} : vector<16x64xf32> to vector<1x64xf32>
    %c0_5 = arith.constant 0 : index
    %c0_6 = arith.constant 0 : index
    %7 = vector.load %arg5[%c0_5, %c0_6] : memref<128x128xbf16, #tpu.memory_space<vmem>>, vector<128x128xbf16>
    %cst_7 = arith.constant dense<0.000000e+00> : vector<64x128xf32>
    %8 = tpu.matmul %2, %7, %cst_7 {dimension_numbers = #tpu.dot_dimension_numbers<[1], [0], [0], [1], [0, 0, 1, 1], [], []>} : vector<64x128xbf16>, vector<128x128xbf16>, vector<64x128xf32> -> vector<64x128xf32>
    %9 = vector.extract_strided_slice %8 {offsets = [0, 127], sizes = [64, 1], strides = [1, 1]} : vector<64x128xf32> to vector<64x1xf32>
    %10 = vector.broadcast %9 : vector<64x1xf32> to vector<64x64xf32>
    %11 = vector.broadcast %6 : vector<1x64xf32> to vector<64x64xf32>
    %12 = arith.addf %10, %11 : vector<64x64xf32>
    %c0_8 = arith.constant 0 : index
    %c0_9 = arith.constant 0 : index
    %13 = vector.load %arg2[%c0_8, %c0_9] : memref<64x64xbf16, #tpu.memory_space<vmem>>, vector<64x64xbf16>
    %cst_10 = arith.constant 0.000000e+00 : bf16
    %14 = vector.broadcast %cst_10 : bf16 to vector<64x64xbf16>
    %15 = arith.cmpf ogt, %13, %14 : vector<64x64xbf16>
    %cst_11 = arith.constant -1.000000e+30 : f32
    %16 = vector.broadcast %cst_11 : f32 to vector<64x64xf32>
    %17 = arith.select %15, %12, %16 : vector<64x64xi1>, vector<64x64xf32>
    %cst_12 = arith.constant dense<0xFF800000> : vector<64xf32>
    %18 = vector.multi_reduction <maximumf>, %17, %cst_12 [1] : vector<64x64xf32> to vector<64xf32>
    %19 = vector.shape_cast %18 : vector<64xf32> to vector<64x1xf32>
    %20 = vector.broadcast %19 : vector<64x1xf32> to vector<64x64xf32>
    %21 = arith.subf %17, %20 : vector<64x64xf32>
    %22 = math.exp %21 : vector<64x64xf32>
    %cst_13 = arith.constant 0.000000e+00 : f32
    %23 = vector.broadcast %cst_13 : f32 to vector<64x64xf32>
    %24 = arith.select %15, %22, %23 : vector<64x64xi1>, vector<64x64xf32>
    %cst_14 = arith.constant dense<0.000000e+00> : vector<64xf32>
    %25 = vector.multi_reduction <add>, %24, %cst_14 [1] : vector<64x64xf32> to vector<64xf32>
    %26 = vector.shape_cast %25 : vector<64xf32> to vector<64x1xf32>
    %cst_15 = arith.constant 0.000000e+00 : f32
    %27 = vector.broadcast %cst_15 : f32 to vector<64x1xf32>
    %28 = arith.cmpf ogt, %26, %27 : vector<64x1xf32>
    %29 = tpu.reciprocal %26 {approx = true} : vector<64x1xf32> -> vector<64x1xf32>
    %cst_16 = arith.constant 0.000000e+00 : f32
    %30 = vector.broadcast %cst_16 : f32 to vector<64x1xf32>
    %31 = arith.select %28, %29, %30 : vector<64x1xi1>, vector<64x1xf32>
    %32 = vector.broadcast %31 : vector<64x1xf32> to vector<64x64xf32>
    %33 = arith.mulf %24, %32 : vector<64x64xf32>
    %34 = arith.truncf %33 : vector<64x64xf32> to vector<64x64xbf16>
    %35 = arith.truncf %8 : vector<64x128xf32> to vector<64x128xbf16>
    %cst_17 = arith.constant dense<0.000000e+00> : vector<64x128xf32>
    %36 = tpu.matmul %34, %35, %cst_17 {dimension_numbers = #tpu.dot_dimension_numbers<[1], [0], [0], [1], [0, 0, 1, 1], [], []>} : vector<64x64xbf16>, vector<64x128xbf16>, vector<64x128xf32> -> vector<64x128xf32>
    %37 = vector.extract_strided_slice %8 {offsets = [0, 125], sizes = [64, 1], strides = [1, 1]} : vector<64x128xf32> to vector<64x1xf32>
    %38 = vector.extract_strided_slice %5 {offsets = [1, 0], sizes = [1, 64], strides = [1, 1]} : vector<16x64xf32> to vector<1x64xf32>
    %c0_18 = arith.constant 0 : index
    %c0_19 = arith.constant 0 : index
    %39 = vector.load %arg6[%c0_18, %c0_19] : memref<128x128xbf16, #tpu.memory_space<vmem>>, vector<128x128xbf16>
    %cst_20 = arith.constant dense<0.000000e+00> : vector<64x128xf32>
    %40 = tpu.matmul %2, %39, %cst_20 {dimension_numbers = #tpu.dot_dimension_numbers<[1], [0], [0], [1], [0, 0, 1, 1], [], []>} : vector<64x128xbf16>, vector<128x128xbf16>, vector<64x128xf32> -> vector<64x128xf32>
    %41 = vector.extract_strided_slice %40 {offsets = [0, 127], sizes = [64, 1], strides = [1, 1]} : vector<64x128xf32> to vector<64x1xf32>
    %42 = vector.broadcast %41 : vector<64x1xf32> to vector<64x64xf32>
    %43 = vector.broadcast %38 : vector<1x64xf32> to vector<64x64xf32>
    %44 = arith.addf %42, %43 : vector<64x64xf32>
    %c0_21 = arith.constant 0 : index
    %c0_22 = arith.constant 0 : index
    %45 = vector.load %arg3[%c0_21, %c0_22] : memref<64x64xbf16, #tpu.memory_space<vmem>>, vector<64x64xbf16>
    %cst_23 = arith.constant 0.000000e+00 : bf16
    %46 = vector.broadcast %cst_23 : bf16 to vector<64x64xbf16>
    %47 = arith.cmpf ogt, %45, %46 : vector<64x64xbf16>
    %cst_24 = arith.constant -1.000000e+30 : f32
    %48 = vector.broadcast %cst_24 : f32 to vector<64x64xf32>
    %49 = arith.select %47, %44, %48 : vector<64x64xi1>, vector<64x64xf32>
    %cst_25 = arith.constant dense<0xFF800000> : vector<64xf32>
    %50 = vector.multi_reduction <maximumf>, %49, %cst_25 [1] : vector<64x64xf32> to vector<64xf32>
    %51 = vector.shape_cast %50 : vector<64xf32> to vector<64x1xf32>
    %52 = vector.broadcast %51 : vector<64x1xf32> to vector<64x64xf32>
    %53 = arith.subf %49, %52 : vector<64x64xf32>
    %54 = math.exp %53 : vector<64x64xf32>
    %cst_26 = arith.constant 0.000000e+00 : f32
    %55 = vector.broadcast %cst_26 : f32 to vector<64x64xf32>
    %56 = arith.select %47, %54, %55 : vector<64x64xi1>, vector<64x64xf32>
    %cst_27 = arith.constant dense<0.000000e+00> : vector<64xf32>
    %57 = vector.multi_reduction <add>, %56, %cst_27 [1] : vector<64x64xf32> to vector<64xf32>
    %58 = vector.shape_cast %57 : vector<64xf32> to vector<64x1xf32>
    %cst_28 = arith.constant 0.000000e+00 : f32
    %59 = vector.broadcast %cst_28 : f32 to vector<64x1xf32>
    %60 = arith.cmpf ogt, %58, %59 : vector<64x1xf32>
    %61 = tpu.reciprocal %58 {approx = true} : vector<64x1xf32> -> vector<64x1xf32>
    %cst_29 = arith.constant 0.000000e+00 : f32
    %62 = vector.broadcast %cst_29 : f32 to vector<64x1xf32>
    %63 = arith.select %60, %61, %62 : vector<64x1xi1>, vector<64x1xf32>
    %64 = vector.broadcast %63 : vector<64x1xf32> to vector<64x64xf32>
    %65 = arith.mulf %56, %64 : vector<64x64xf32>
    %66 = arith.truncf %65 : vector<64x64xf32> to vector<64x64xbf16>
    %67 = arith.truncf %40 : vector<64x128xf32> to vector<64x128xbf16>
    %cst_30 = arith.constant dense<0.000000e+00> : vector<64x128xf32>
    %68 = tpu.matmul %66, %67, %cst_30 {dimension_numbers = #tpu.dot_dimension_numbers<[1], [0], [0], [1], [0, 0, 1, 1], [], []>} : vector<64x64xbf16>, vector<64x128xbf16>, vector<64x128xf32> -> vector<64x128xf32>
    %69 = vector.extract_strided_slice %40 {offsets = [0, 125], sizes = [64, 1], strides = [1, 1]} : vector<64x128xf32> to vector<64x1xf32>
    %c0_31 = arith.constant 0 : index
    %c0_32 = arith.constant 0 : index
    %70 = vector.load %arg7[%c0_31, %c0_32] : memref<128x128xbf16, #tpu.memory_space<vmem>>, vector<128x128xbf16>
    %cst_33 = arith.constant dense<0.000000e+00> : vector<64x128xf32>
    %71 = tpu.matmul %2, %70, %cst_33 {dimension_numbers = #tpu.dot_dimension_numbers<[1], [0], [0], [1], [0, 0, 1, 1], [], []>} : vector<64x128xbf16>, vector<128x128xbf16>, vector<64x128xf32> -> vector<64x128xf32>
    %c0_34 = arith.constant 0 : index
    %c0_35 = arith.constant 0 : index
    %72 = vector.load %arg9[%c0_34, %c0_35] : memref<128x128xbf16, #tpu.memory_space<vmem>>, vector<128x128xbf16>
    %cst_36 = arith.constant dense<0.000000e+00> : vector<32x128xf32>
    %73 = tpu.matmul %3, %72, %cst_36 {dimension_numbers = #tpu.dot_dimension_numbers<[1], [0], [0], [1], [0, 0, 1, 1], [], []>} : vector<32x128xbf16>, vector<128x128xbf16>, vector<32x128xf32> -> vector<32x128xf32>
    %74 = vector.extract_strided_slice %73 {offsets = [0, 0], sizes = [32, 1], strides = [1, 1]} : vector<32x128xf32> to vector<32x1xf32>
    %75 = vector.extract_strided_slice %5 {offsets = [2, 0], sizes = [1, 64], strides = [1, 1]} : vector<16x64xf32> to vector<1x64xf32>
    %76 = vector.broadcast %74 : vector<32x1xf32> to vector<32x64xf32>
    %77 = vector.broadcast %75 : vector<1x64xf32> to vector<32x64xf32>
    %78 = arith.addf %76, %77 : vector<32x64xf32>
    %c0_37 = arith.constant 0 : index
    %c0_38 = arith.constant 0 : index
    %79 = vector.load %arg4[%c0_37, %c0_38] : memref<32x64xbf16, #tpu.memory_space<vmem>>, vector<32x64xbf16>
    %cst_39 = arith.constant 0.000000e+00 : bf16
    %80 = vector.broadcast %cst_39 : bf16 to vector<32x64xbf16>
    %81 = arith.cmpf ogt, %79, %80 : vector<32x64xbf16>
    %cst_40 = arith.constant -1.000000e+30 : f32
    %82 = vector.broadcast %cst_40 : f32 to vector<32x64xf32>
    %83 = arith.select %81, %78, %82 : vector<32x64xi1>, vector<32x64xf32>
    %cst_41 = arith.constant dense<0xFF800000> : vector<32xf32>
    %84 = vector.multi_reduction <maximumf>, %83, %cst_41 [1] : vector<32x64xf32> to vector<32xf32>
    %85 = vector.shape_cast %84 : vector<32xf32> to vector<32x1xf32>
    %86 = vector.broadcast %85 : vector<32x1xf32> to vector<32x64xf32>
    %87 = arith.subf %83, %86 : vector<32x64xf32>
    %88 = math.exp %87 : vector<32x64xf32>
    %cst_42 = arith.constant 0.000000e+00 : f32
    %89 = vector.broadcast %cst_42 : f32 to vector<32x64xf32>
    %90 = arith.select %81, %88, %89 : vector<32x64xi1>, vector<32x64xf32>
    %cst_43 = arith.constant dense<0.000000e+00> : vector<32xf32>
    %91 = vector.multi_reduction <add>, %90, %cst_43 [1] : vector<32x64xf32> to vector<32xf32>
    %92 = vector.shape_cast %91 : vector<32xf32> to vector<32x1xf32>
    %cst_44 = arith.constant 0.000000e+00 : f32
    %93 = vector.broadcast %cst_44 : f32 to vector<32x1xf32>
    %94 = arith.cmpf ogt, %92, %93 : vector<32x1xf32>
    %95 = tpu.reciprocal %92 {approx = true} : vector<32x1xf32> -> vector<32x1xf32>
    %cst_45 = arith.constant 0.000000e+00 : f32
    %96 = vector.broadcast %cst_45 : f32 to vector<32x1xf32>
    %97 = arith.select %94, %95, %96 : vector<32x1xi1>, vector<32x1xf32>
    %98 = vector.broadcast %97 : vector<32x1xf32> to vector<32x64xf32>
    %99 = arith.mulf %90, %98 : vector<32x64xf32>
    %100 = arith.truncf %99 : vector<32x64xf32> to vector<32x64xbf16>
    %101 = arith.truncf %71 : vector<64x128xf32> to vector<64x128xbf16>
    %cst_46 = arith.constant dense<0.000000e+00> : vector<32x128xf32>
    %102 = tpu.matmul %100, %101, %cst_46 {dimension_numbers = #tpu.dot_dimension_numbers<[1], [0], [0], [1], [0, 0, 1, 1], [], []>} : vector<32x64xbf16>, vector<64x128xbf16>, vector<32x128xf32> -> vector<32x128xf32>
    %103 = vector.extract_strided_slice %36 {offsets = [0, 126], sizes = [64, 1], strides = [1, 1]} : vector<64x128xf32> to vector<64x1xf32>
    %104 = arith.addf %37, %103 : vector<64x1xf32>
    %c0_47 = arith.constant 0 : index
    %105 = memref.load %arg10[%c0_47] : memref<3xf32, #tpu.memory_space<smem>>
    %106 = vector.broadcast %105 : f32 to vector<64x1xf32>
    %107 = arith.addf %104, %106 : vector<64x1xf32>
    %108 = vector.extract_strided_slice %68 {offsets = [0, 126], sizes = [64, 1], strides = [1, 1]} : vector<64x128xf32> to vector<64x1xf32>
    %109 = arith.addf %69, %108 : vector<64x1xf32>
    %c1 = arith.constant 1 : index
    %110 = memref.load %arg10[%c1] : memref<3xf32, #tpu.memory_space<smem>>
    %111 = vector.broadcast %110 : f32 to vector<64x1xf32>
    %112 = arith.addf %109, %111 : vector<64x1xf32>
    %113 = arith.maximumf %107, %112 : vector<64x1xf32>
    %114 = arith.subf %107, %113 : vector<64x1xf32>
    %115 = math.exp %114 : vector<64x1xf32>
    %116 = arith.subf %112, %113 : vector<64x1xf32>
    %117 = math.exp %116 : vector<64x1xf32>
    %118 = arith.addf %115, %117 : vector<64x1xf32>
    %119 = tpu.reciprocal %118 {approx = true} : vector<64x1xf32> -> vector<64x1xf32>
    %120 = arith.mulf %115, %119 : vector<64x1xf32>
    %121 = vector.broadcast %120 : vector<64x1xf32> to vector<64x128xf32>
    %122 = arith.mulf %121, %36 : vector<64x128xf32>
    %123 = arith.addf %0, %122 : vector<64x128xf32>
    %124 = arith.mulf %117, %119 : vector<64x1xf32>
    %125 = vector.broadcast %124 : vector<64x1xf32> to vector<64x128xf32>
    %126 = arith.mulf %125, %68 : vector<64x128xf32>
    %127 = arith.addf %123, %126 : vector<64x128xf32>
    %c0_48 = arith.constant 0 : index
    %c0_49 = arith.constant 0 : index
    %128 = vector.load %arg12[%c0_48, %c0_49] : memref<64x128xf32, #tpu.memory_space<vmem>>, vector<64x128xf32>
    tpu.vector_store %arg12[%c0_48, %c0_49], %127 {strides = array<i32>} : memref<64x128xf32, #tpu.memory_space<vmem>>, vector<64x128xf32>,
    %129 = vector.extract_strided_slice %73 {offsets = [0, 1], sizes = [32, 1], strides = [1, 1]} : vector<32x128xf32> to vector<32x1xf32>
    %130 = vector.extract_strided_slice %102 {offsets = [0, 126], sizes = [32, 1], strides = [1, 1]} : vector<32x128xf32> to vector<32x1xf32>
    %131 = arith.addf %129, %130 : vector<32x1xf32>
    %c2 = arith.constant 2 : index
    %132 = memref.load %arg10[%c2] : memref<3xf32, #tpu.memory_space<smem>>
    %133 = vector.broadcast %132 : f32 to vector<32x1xf32>
    %134 = arith.addf %131, %133 : vector<32x1xf32>
    %135 = vector.broadcast %134 : vector<32x1xf32> to vector<32x128xf32>
    %136 = arith.mulf %135, %102 : vector<32x128xf32>
    %137 = arith.addf %1, %136 : vector<32x128xf32>
    %c0_50 = arith.constant 0 : index
    %c0_51 = arith.constant 0 : index
    %138 = vector.load %arg11[%c0_50, %c0_51] : memref<32x128xf32, #tpu.memory_space<vmem>>, vector<32x128xf32>
    tpu.vector_store %arg11[%c0_50, %c0_51], %137 {strides = array<i32>} : memref<32x128xf32, #tpu.memory_space<vmem>>, vector<32x128xf32>,
    return
  }
}

</mosaic_0001>

<bundles_post_ra>
// kernel: forward.1
= control target key start
LH: loop header
LB: loop body
LE: loop exit
PB: predicated region body
PF: predicated region fallthrough
CT: control target
= control target key end

     0   :  { %18 = vsyncpa [#allocation3], 0  ;;  %s3067_s0 = inlined_call_operand.vmem [shape: f32[64,128], index: 0, kind: input, shape index: {}]   ;;  %s3068_s1 = inlined_call_operand.vmem [shape: f32[32,128], index: 1, kind: input, shape index: {}]   ;;  %s3069_s2 = inlined_call_operand.hbm [shape: bf16[64,64], index: 2, kind: input, shape index: {}]   ;;  %s3070_s3 = inlined_call_operand.hbm [shape: bf16[64,64], index: 3, kind: input, shape index: {}]   ;;  %s3071_s4 = inlined_call_operand.hbm [shape: bf16[32,64], index: 4, kind: input, shape index: {}]   ;;  %s3072_s5 = inlined_call_operand.hbm [shape: bf16[128,128], index: 5, kind: input, shape index: {}]   ;;  %s3073_s6 = inlined_call_operand.vmem [shape: bf16[128,128], index: 6, kind: input, shape index: {}]   ;;  %s3074_s7 = inlined_call_operand.vmem [shape: bf16[128,128], index: 7, kind: input, shape index: {}]   ;;  %s3075_s8 = inlined_call_operand.hbm [shape: bf16[16,128], index: 8, kind: input, shape index: {}]   ;;  %s3076_s9 = inlined_call_operand.vmem [shape: bf16[128,128], index: 9, kind: input, shape index: {}]   ;;  %s3077_s10 = inlined_call_operand.vmem [shape: f32[3], index: 10, kind: input, shape index: {}]   ;;  %s3078_s11 = inlined_call_operand.hbm [shape: f32[32,128], index: 11, kind: output, shape index: {0}]   ;;  %s3079_s12 = inlined_call_operand.hbm [shape: f32[64,128], index: 12, kind: output, shape index: {1}]  }
   0x1   :  { %19 = vsyncpa [#allocation7], 0 }
   0x2   :  { %20 = vsyncpa [#allocation10], 0 }
   0x3   :  { %21 = vsyncpa [#allocation5], 0 }
   0x4   :  { %22 = vsyncpa [#allocation4], 0 }
   0x5   :  { %23 = vsyncpa [#allocation15], 0  ;;  %s45_s23 = sshll.u32 %s3070_s3, 4  ;;  %s2143_s24 = smov [#allocation6]   ;;  %s46_s23 = int_to_ptr.hbm [resolvable:$true] %s45_s23 }
   0x6   :  { %s47_s25 = sshll.u32 %s2143_s24, 4  ;;  %s71_s28 = sshll.u32 %s3072_s5, 4  ;;  %s48_s25 = int_to_ptr.vmem [resolvable:$true] %s47_s25  ;;  %s72_s28 = int_to_ptr.hbm [resolvable:$true] %s71_s28 }
   0x7   :  { %s2144_s29 = smov 64   ;;  %s2145_s30 = smov 4  }
   0x8   :  { %53 = dma.hbm_to_vmem [thread:$0]  %s46_s23, 512, %s48_s25, [#allocation7], %s2144_s29, %s2144_s29, %s2145_s30  }
   0x9   :  { %s2146_s13 = smov [#allocation9]   ;;  %s32_s3 = sshll.u32 %s3069_s2, 4  ;;  %s33_s3 = int_to_ptr.hbm [resolvable:$true] %s32_s3 }
   0xa   :  { %s73_s14 = sshll.u32 %s2146_s13, 4  ;;  %s58_s18 = sshll.u32 %s3071_s4, 4  ;;  %s74_s14 = int_to_ptr.vmem [resolvable:$true] %s73_s14  ;;  %s59_s18 = int_to_ptr.hbm [resolvable:$true] %s58_s18 }
   0xb   :  { %79 = dma.hbm_to_vmem [thread:$0]  %s72_s28, 1024, %s74_s14, [#allocation10], %s2144_s29, %s2144_s29, %s2145_s30  }
   0xc   :  { %s2147_s19 = smov [#allocation2]   ;;  %s2148_s21 = smov [#allocation8]  }
   0xd   :  { %s34_s20 = sshll.u32 %s2147_s19, 4  ;;  %s60_s2 = sshll.u32 %s2148_s21, 4  ;;  %s35_s20 = int_to_ptr.vmem [resolvable:$true] %s34_s20  ;;  %s61_s2 = int_to_ptr.vmem [resolvable:$true] %s60_s2 }
   0xe   :  { %40 = dma.hbm_to_vmem [thread:$0]  %s33_s3, 512, %s35_s20, [#allocation3], %s2144_s29, %s2144_s29, %s2145_s30  }
   0xf   :  { %s88_s24 = sshll.u32 %s3075_s8, 4  ;;  %s104_s26 = sshll.u32 %s3077_s10, 4  ;;  %s89_s24 = int_to_ptr.hbm [resolvable:$true] %s88_s24  ;;  %s105_s26 = int_to_ptr.vmem [resolvable:$true] %s104_s26 }
  0x10   :  { %66 = dma.hbm_to_vmem [thread:$0]  %s59_s18, 256, %s61_s2, [#allocation7], %s2144_s29, %s2144_s29, %s2145_s30  }
  0x11   :  { %s2149_s27 = smov [#allocation11]   ;;  %s2150_s13 = smov [#allocation12]  }
  0x12   :  { %s90_s28 = sshll.u32 %s2149_s27, 4  ;;  %s91_s28 = int_to_ptr.vmem [resolvable:$true] %s90_s28 }
  0x13   :  { %96 = dma.hbm_to_vmem [thread:$0]  %s89_s24, 128, %s91_s28, [#allocation10], %s2144_s29, %s2144_s29, %s2145_s30  }
  0x14   :  { %107 = dma.vmem_to_smem %s105_s26, 16, %s2150_s13, [#allocation5]  }
  0x15   :  { %2131 = dma.done.wait [#allocation3], 512  }
  0x16   :  { %2132 = vsyncadd [#allocation3], 4294966784 }
  0x17   :  { %2133 = dma.done.wait [#allocation7], 768  }
  0x18   :  { %2134 = vsyncadd [#allocation7], 4294966528 }
  0x19   :  { %2135 = dma.done.wait [#allocation10], 1152  }
  0x1a   :  { %2136 = vsyncadd [#allocation10], 4294966144 }
  0x1b   :  { %2137 = dma.done.wait [#allocation5], 16  }
  0x1c   :  { %2138 = vsyncadd [#allocation5], 4294967280 }
  0x1d   :  { %132 = sfence }
  0x1e   :  { %v1706_v0 = vld [vmem:[#allocation9 + $0x38] sm:$0xff]  ;;  %v1705_v1 = vld [vmem:[#allocation9 + $0x30] sm:$0xff]  ;;  %v1704_v2 = vld [vmem:[#allocation9 + $0x28] sm:$0xff]  ;;  %v2151_v21 = vmov 127   ;;  %vm347_vm1 = vcmask 523264   ;;  %s1696_s27 = sld [smem:[#allocation12 + $0x1]] }
  0x1f   :  { %237 = vmatpush.bf16.msra.mxu1 %v1706_v0  ;;  %v1703_v3 = vld [vmem:[#allocation9 + $0x20] sm:$0xff]  ;;  %v1702_v4 = vld [vmem:[#allocation9 + $0x18] sm:$0xff]  ;;  %v1701_v5 = vld [vmem:[#allocation9 + $0x10] sm:$0xff]  ;;  %1800 = vset.pattern.permute.xlu0 %v2151_v21  ;;  %s1188_s28 = sld [smem:[#allocation12]]  ;;  %s2155_s13 = smov 3  }
  0x20   :  { %v1700_v6 = vld [vmem:[#allocation9 + $0x8] sm:$0xff]  ;;  %v1699_v7 = vld [vmem:[#allocation9] sm:$0xff]  ;;  %v134_v8 = vld [vmem:[%s3067_s0] sm:$0xff]  ;;  %1801 = vset.pattern.permute.xlu1 %v2151_v21  ;;  %1802 = vset.pattern.permute.xlu2 %v2151_v21  ;;  %s1697_s8 = sld [smem:[#allocation12 + $0x2]]  ;;  %s2157_s25 = smov [#allocation14]  }
  0x21   :  { %v135_v9 = vld [vmem:[%s3067_s0 + $0x8] sm:$0xff]  ;;  %v140_v11 = vld [vmem:[%s3067_s0 + $0x30] sm:$0xff]  ;;  %v141_v12 = vld [vmem:[%s3067_s0 + $0x38] sm:$0xff]  ;;  %s1531_s26 = sshll.u32 %s2157_s25, 4  ;;  %s2158_s10 = smov 128   ;;  %s1532_s26 = int_to_ptr.vmem [resolvable:$true] %s1531_s26 }
  0x22   :  { %v2265_v10 = vpack.c.bf16 %v135_v9, %v134_v8  ;;  %v2274_v13 = vpack.c.bf16 %v141_v12, %v140_v11  ;;  %v138_v14 = vld [vmem:[%s3067_s0 + $0x20] sm:$0xff]  ;;  %v139_v15 = vld [vmem:[%s3067_s0 + $0x28] sm:$0xff]  ;;  %v136_v16 = vld [vmem:[%s3067_s0 + $0x10] sm:$0xff]  ;;  %s2159_s29 = smov 8  }
  0x23   :  { %238 = vmatpush.bf16.msra.mxu1 %v1705_v1  ;;  %v137_v17 = vld [vmem:[%s3067_s0 + $0x18] sm:$0xff]  ;;  %v2289_v18 = vpack.c.bf16 %v139_v15, %v138_v14  ;;  %v1698_v20 = vld [vmem:[#allocation11] sm:$0xff]  ;;  %v1712_v30 = vld [vmem:[%s3073_s6 + $0x28] sm:$0xff] }
  0x24   :  { %164 = vmatpush.bf16.xpose.msra.mxu0 %v2274_v13  ;;  %v2292_v19 = vpack.c.bf16 %v137_v17, %v136_v16  ;;  %v1714_v27 = vld [vmem:[%s3073_s6 + $0x38] sm:$0xff]  ;;  %v1713_v29 = vld [vmem:[%s3073_s6 + $0x30] sm:$0xff]  ;;  %v1711_v32 = vld [vmem:[%s3073_s6 + $0x20] sm:$0xff] }
  0x25   :  { %573 = vmatpush.bf16.msra.mxu3 %v1714_v27  ;;  %v1710_v39 = vld [vmem:[%s3073_s6 + $0x18] sm:$0xff]  ;;  %v1709_v40 = vld [vmem:[%s3073_s6 + $0x10] sm:$0xff]  ;;  %v1708_v42 = vld [vmem:[%s3073_s6 + $0x8] sm:$0xff] }
  0x26   :  { %v1707_v43 = vld [vmem:[%s3073_s6] sm:$0xff]  ;;  %v1771_v44 = vld [vmem:[#allocation2 + $0x8] sm:$0xff]   ;;  %v1773_v50 = vld [vmem:[#allocation2 + $0x18] sm:$0xff]  }
  0x27   :  { %239 = vmatpush.bf16.msra.mxu1 %v1704_v2  ;;  %v1737_v45 = vunpack.c.l.bf16 %v1771_v44  ;;  %v1738_v53 = vunpack.c.h.bf16 %v1771_v44  ;;  %v1745_v54 = vunpack.c.l.bf16 %v1773_v50  ;;  %v1772_v61 = vld [vmem:[#allocation2 + $0x10] sm:$0xff]   ;;  %v1726_v44 = vld [vmem:[%s3076_s9 + $0x18] sm:$0xff]  ;;  %v1724_v48 = vld [vmem:[%s3076_s9 + $0x8] sm:$0xff] }
  0x28   :  { %v1741_v2 = vunpack.c.l.bf16 %v1772_v61  ;;  %v1742_v16 = vunpack.c.h.bf16 %v1772_v61  ;;  %v143_v57 = vld [vmem:[%s3068_s1 + $0x8] sm:$0xff] }
  0x29   :  { %574 = vmatpush.bf16.msra.mxu3 %v1713_v29  ;;  %vm2359_vm0 = vcmp.gt.f32.partialorder %v1737_v45, 0.0  ;;  %vm2368_vm2 = vcmp.gt.f32.partialorder %v1738_v53, 0.0  ;;  %vm2372_vm3 = vcmp.gt.f32.partialorder %v1745_v54, 0.0 }
  0x2a   :  { %vm2387_vm4 = vcmp.gt.f32.partialorder %v1741_v2, 0.0  ;;  %vm2407_vm6 = vcmp.gt.f32.partialorder %v1742_v16, 0.0 }
  0x2b   :  { %240 = vmatpush.bf16.msra.mxu1 %v1703_v3  ;;  %v1746_v3 = vunpack.c.h.bf16 %v1773_v50 }
  0x2c   :  { %165 = vmatpush.bf16.xpose.msra.mxu0 %v2289_v18 }
  0x2d   :  { %575 = vmatpush.bf16.msra.mxu3 %v1712_v30  ;;  %vm2391_vm5 = vcmp.gt.f32.partialorder %v1746_v3, 0.0 }
  0x2f   :  { %241 = vmatpush.bf16.msra.mxu1 %v1702_v4 }
  0x31   :  { %576 = vmatpush.bf16.msra.mxu3 %v1711_v32  ;;  %v1730_v32 = vld [vmem:[%s3076_s9 + $0x38] sm:$0xff] }
  0x33   :  { %242 = vmatpush.bf16.msra.mxu1 %v1701_v5 }
  0x34   :  { %166 = vmatpush.bf16.xpose.msra.mxu0 %v2292_v19 }
  0x35   :  { %577 = vmatpush.bf16.msra.mxu3 %v1710_v39 }
  0x37   :  { %243 = vmatpush.bf16.msra.mxu1 %v1700_v6 }
  0x39   :  { %578 = vmatpush.bf16.msra.mxu3 %v1709_v40 }
  0x3b   :  { %244 = vmatpush.bf16.msra.mxu1 %v1699_v7 }
  0x3c   :  { %167 = vmatpush.bf16.xpose.msra.mxu0 %v2265_v10 }
  0x3d   :  { %579 = vmatpush.bf16.msra.mxu3 %v1708_v42 }
  0x3e   :  { %245 = vmatmul.bf16.vlgmr.msra.gmra.mxu1 %v2265_v10 }
  0x3f   :  { %1001 = vmatpush.bf16.msrb.mxu1 %v1730_v32 }
  0x41   :  { %580 = vmatpush.bf16.msra.mxu3 %v1707_v43 }
  0x43   :  { %168 = vmatmul.bf16.vlgmr.msra.gmra.mxu0 %v1698_v20  ;;  %v145_v20 = vld [vmem:[%s3068_s1 + $0x18] sm:$0xff] }
  0x44   :  { %581 = vmatmul.bf16.vlgmr.msra.gmra.mxu3 %v2265_v10 }
  0x4e   :  { %250 = vmatmul.bf16.gmra.mxu1 %v2292_v19 }
  0x54   :  { %586 = vmatmul.bf16.gmra.mxu3 %v2292_v19 }
  0x5e   :  { %255 = vmatmul.bf16.gmra.mxu1 %v2289_v18 }
  0x64   :  { %591 = vmatmul.bf16.gmra.mxu3 %v2289_v18 }
  0x6e   :  { %260 = vmatmul.bf16.gmra.mxu1 %v2274_v13 }
  0x74   :  { %596 = vmatmul.bf16.gmra.mxu3 %v2274_v13 }
  0xbb   :  { %v2299_v22 = vpop.f32.mrf.mxu1 }
  0xc0   :  { %v2341_v38 = vpop.f32.mrf.mxu0 }
  0xc1   :  { %v2357_v46 = vperm.slane %v2341_v38, 0 }
  0xc3   :  { %v2301_v23 = vpop.f32.mrf.mxu1 }
  0xc4   :  { %v464_v37 = vpack.c.bf16 %v2301_v23, %v2299_v22 }
  0xc7   :  { %v2416_v30 = vpop.f32.mrf.mxu3 }
  0xc8   :  { %v171_v41 = vpop.f32.mrf.mxu0 }
  0xc9   :  { %v1727_v41 = vld [vmem:[%s3076_s9 + $0x20] sm:$0xff] }
  0xcb   :  { %v2303_v24 = vpop.f32.mrf.mxu1 }
  0xcc   :  { %278 = vperm.xlu0 %1800, %v2303_v24  }
  0xcf   :  { %v2427_v40 = vpop.f32.mrf.mxu3 }
  0xd3   :  { %v2306_v25 = vpop.f32.mrf.mxu1 }
  0xd4   :  { %283 = vperm.xlu0 %1800, %v2306_v25   ;;  %v465_v36 = vpack.c.bf16 %v2306_v25, %v2303_v24 }
  0xd7   :  { %v2439_v50 = vpop.f32.mrf.mxu3 }
  0xdb   :  { %v2309_v26 = vpop.f32.mrf.mxu1 }
  0xdc   :  { %288 = vperm.xlu1 %1801, %v2309_v26  }
  0xe3   :  { %v2315_v28 = vpop.f32.mrf.mxu1 }
  0xe4   :  { %293 = vperm.xlu1 %1801, %v2315_v28   ;;  %v466_v35 = vpack.c.bf16 %v2315_v28, %v2309_v26 }
  0xeb   :  { %v2324_v31 = vpop.f32.mrf.mxu1 }
  0xec   :  { %298 = vperm.xlu2 %1802, %v2324_v31  }
  0xf3   :  { %v2330_v33 = vpop.f32.mrf.mxu1 }
  0xf4   :  { %303 = vperm.xlu2 %1802, %v2330_v33   ;;  %v467_v34 = vpack.c.bf16 %v2330_v33, %v2324_v31 }
  0xf6   :  { %484 = vmatpush.bf16.msrb.mxu0 %v467_v34  ;;  %1778 = vmatpush.bf16.msra.mxu2 %v467_v34  ;;  %v1729_v34 = vld [vmem:[%s3076_s9 + $0x30] sm:$0xff] }
  0xf7   :  { %1002 = vmatpush.bf16.msrb.mxu1 %v1729_v34 }
  0xfa   :  { %485 = vmatpush.bf16.msrb.mxu0 %v466_v35  ;;  %1779 = vmatpush.bf16.msra.mxu2 %v466_v35 }
  0xfe   :  { %486 = vmatpush.bf16.msrb.mxu0 %v465_v36  ;;  %1780 = vmatpush.bf16.msra.mxu2 %v465_v36 }
 0x102   :  { %487 = vmatpush.bf16.msrb.mxu0 %v464_v37  ;;  %1781 = vmatpush.bf16.msra.mxu2 %v464_v37  ;;  %v1728_v37 = vld [vmem:[%s3076_s9 + $0x28] sm:$0xff] }
 0x103   :  { %1003 = vmatpush.bf16.msrb.mxu1 %v1728_v37 }
 0x107   :  { %1004 = vmatpush.bf16.msrb.mxu1 %v1727_v41 }
 0x10b   :  { %1005 = vmatpush.bf16.msrb.mxu1 %v1726_v44 }
 0x13e   :  { %v279_v47 = vpop.permute.xlu0 %278 }
 0x13f   :  { %v309_v49 = vadd.f32 %v2357_v46, %v279_v47 }
 0x141   :  { %v341_v51 = vsel %vm2359_vm0, %v309_v49, -1e+30 }
 0x142   :  { %v354_v52 = vsel %vm347_vm1, %v341_v51, -inf }
 0x143   :  { %355 = vmax.xlane.f32.xlu0 %v354_v52  ;;  %v1725_v52 = vld [vmem:[%s3076_s9 + $0x10] sm:$0xff] }
 0x144   :  { %1006 = vmatpush.bf16.msrb.mxu1 %v1725_v52 }
 0x146   :  { %v284_v55 = vpop.permute.xlu0 %283  ;;  %v299_v56 = vpop.permute.xlu2 %298 }
 0x147   :  { %v310_v59 = vadd.f32 %v2357_v46, %v284_v55  ;;  %v313_v60 = vadd.f32 %v2357_v46, %v299_v56 }
 0x148   :  { %1007 = vmatpush.bf16.msrb.mxu1 %v1724_v48 }
 0x149   :  { %v342_v62 = vsel %vm2368_vm2, %v310_v59, -1e+30  ;;  %v2382_v63 = vsel %vm2372_vm3, %v313_v60, -1e+30  ;;  %v2453_v60 = vpop.f32.mrf.mxu3 }
 0x14a   :  { %v357_v0 = vsel %vm347_vm1, %v342_v62, -inf  ;;  %v366_v1 = vsel %vm347_vm1, %v2382_v63, -inf }
 0x14b   :  { %358 = vmax.xlane.f32.xlu1 %v357_v0  ;;  %367 = vmax.xlane.f32.xlu0 %v366_v1  ;;  %v142_v0 = vld [vmem:[%s3068_s1] sm:$0xff] }
 0x14c   :  { %v150_v3 = vpack.c.bf16 %v143_v57, %v142_v0  ;;  %v1732_v57 = vld [vmem:[#allocation2] sm:$0xff]  }
 0x14e   :  { %v289_v4 = vpop.permute.xlu1 %288  ;;  %v304_v5 = vpop.permute.xlu2 %303 }
 0x14f   :  { %v311_v8 = vadd.f32 %v2357_v46, %v289_v4  ;;  %v314_v9 = vadd.f32 %v2357_v46, %v304_v5 }
 0x151   :  { %v343_v11 = vsel %vm2387_vm4, %v311_v8, -1e+30  ;;  %v2402_v12 = vsel %vm2391_vm5, %v314_v9, -1e+30  ;;  %v2470_v9 = vpop.f32.mrf.mxu3 }
 0x152   :  { %v360_v14 = vsel %vm347_vm1, %v343_v11, -inf  ;;  %v369_v15 = vsel %vm347_vm1, %v2402_v12, -inf }
 0x153   :  { %361 = vmax.xlane.f32.xlu2 %v360_v14  ;;  %370 = vmax.xlane.f32.xlu1 %v369_v15 }
 0x156   :  { %v294_v17 = vpop.permute.xlu1 %293 }
 0x157   :  { %v312_v21 = vadd.f32 %v2357_v46, %v294_v17 }
 0x159   :  { %v344_v27 = vsel %vm2407_vm6, %v312_v21, -1e+30  ;;  %v2478_v16 = vpop.f32.mrf.mxu3 }
 0x15a   :  { %v363_v29 = vsel %vm347_vm1, %v344_v27, -inf  ;;  %v801_v34 = vpack.c.bf16 %v2478_v16, %v2470_v9 }
 0x15b   :  { %364 = vmax.xlane.f32.xlu2 %v363_v29 }
 0x161   :  { %v2483_v17 = vpop.f32.mrf.mxu3 }
 0x169   :  { %v2485_v21 = vpop.f32.mrf.mxu3 }
 0x16a   :  { %v802_v29 = vpack.c.bf16 %v2485_v21, %v2483_v17 }
 0x16c   :  { %819 = vmatpush.bf16.msra.mxu0 %v802_v29 }
 0x170   :  { %820 = vmatpush.bf16.msra.mxu0 %v801_v34 }
 0x1b6   :  { %v356_v35 = vpop.xlane.xlu0 %355 }
 0x1b7   :  { %v374_v36 = vsub.f32 %v341_v51, %v356_v35  ;;  %v800_v35 = vpack.c.bf16 %v2453_v60, %v2439_v50 }
 0x1b9   :  { %v384_v39 = vmul.f32 1.442695, %v374_v36  ;;  %821 = vmatpush.bf16.msra.mxu0 %v800_v35 }
 0x1bb   :  { %1811 = vpow2.f32 %v384_v39  ;;  %v799_v39 = vpack.c.bf16 %v2427_v40, %v2416_v30 }
 0x1bd   :  { %822 = vmatpush.bf16.msra.mxu0 %v799_v39 }
 0x1be   :  { %v359_v42 = vpop.xlane.xlu1 %358  ;;  %v368_v36 = vpop.xlane.xlu0 %367 }
 0x1bf   :  { %v375_v43 = vsub.f32 %v342_v62, %v359_v42  ;;  %v1723_v62 = vld [vmem:[%s3076_s9] sm:$0xff]  ;;  %v378_v37 = vsub.f32 %v2382_v63, %v368_v36  ;;  %s2160_s9 = smov [#allocation13]  }
 0x1c0   :  { %1008 = vmatpush.bf16.msrb.mxu1 %v1723_v62  ;;  %s1518_s30 = sshll.u32 %s2160_s9, 4  ;;  %s1519_s30 = int_to_ptr.vmem [resolvable:$true] %s1518_s30 }
 0x1c1   :  { %v1812_v45 = vpop.eup %1811  ;;  %v386_v47 = vmul.f32 1.442695, %v375_v43  ;;  %v392_v41 = vmul.f32 1.442695, %v378_v37 }
 0x1c2   :  { %v2437_v49 = vsel %vm2359_vm0, %v1812_v45, 0.0 }
 0x1c3   :  { %1813 = vpow2.f32 %v386_v47  ;;  %v410_v51 = vsel %vm347_vm1, %v2437_v49, 0.0  ;;  %1009 = vmatmul.bf16.vlgmr.msrb.gmra.mxu1 %v150_v3  ;;  %v2152_v3 = vmov 0  }
 0x1c4   :  { %411 = vadd.xlane.f32.xlu2 %v410_v51 }
 0x1c6   :  { %v362_v53 = vpop.xlane.xlu2 %361  ;;  %v371_v44 = vpop.xlane.xlu1 %370 }
 0x1c7   :  { %v376_v54 = vsub.f32 %v343_v11, %v362_v53  ;;  %v379_v45 = vsub.f32 %v2402_v12, %v371_v44 }
 0x1c9   :  { %v1814_v55 = vpop.eup %1813  ;;  %v388_v56 = vmul.f32 1.442695, %v376_v54  ;;  %v394_v47 = vmul.f32 1.442695, %v379_v45 }
 0x1ca   :  { %v2451_v59 = vsel %vm2368_vm2, %v1814_v55, 0.0 }
 0x1cb   :  { %1815 = vpow2.f32 %v388_v56  ;;  %v413_v61 = vsel %vm347_vm1, %v2451_v59, 0.0 }
 0x1cc   :  { %414 = vadd.xlane.f32.xlu0 %v413_v61 }
 0x1ce   :  { %v365_v1 = vpop.xlane.xlu2 %364 }
 0x1cf   :  { %v377_v2 = vsub.f32 %v344_v27, %v365_v1  ;;  %v144_v27 = vld [vmem:[%s3068_s1 + $0x10] sm:$0xff]  ;;  %v1734_v1 = vunpack.c.h.bf16 %v1732_v57 }
 0x1d0   :  { %v151_v32 = vpack.c.bf16 %v145_v20, %v144_v27 }
 0x1d1   :  { %v1816_v4 = vpop.eup %1815  ;;  %v390_v5 = vmul.f32 1.442695, %v377_v2  ;;  %vm2525_vm9 = vcmp.gt.f32.partialorder %v1734_v1, 0.0 }
 0x1d2   :  { %v2468_v8 = vsel %vm2387_vm4, %v1816_v4, 0.0 }
 0x1d3   :  { %1817 = vpow2.f32 %v390_v5  ;;  %v416_v11 = vsel %vm347_vm1, %v2468_v8, 0.0  ;;  %1014 = vmatmul.bf16.gmra.mxu1 %v151_v32 }
 0x1d4   :  { %417 = vadd.xlane.f32.xlu1 %v416_v11  ;;  %1819 = vpow2.f32 %v392_v41 }
 0x1d5   :  { %1821 = vpow2.f32 %v394_v47 }
 0x1d9   :  { %v1818_v14 = vpop.eup %1817 }
 0x1da   :  { %v2476_v15 = vsel %vm2407_vm6, %v1818_v14, 0.0  ;;  %v1820_v42 = vpop.eup %1819 }
 0x1db   :  { %v419_v6 = vsel %vm347_vm1, %v2476_v15, 0.0  ;;  %v2509_v43 = vsel %vm2372_vm3, %v1820_v42, 0.0  ;;  %v1822_v51 = vpop.eup %1821 }
 0x1dc   :  { %420 = vadd.xlane.f32.xlu2 %v419_v6  ;;  %v422_v63 = vsel %vm347_vm1, %v2509_v43, 0.0  ;;  %v2517_v52 = vsel %vm2391_vm5, %v1822_v51, 0.0 }
 0x1dd   :  { %v425_v58 = vsel %vm347_vm1, %v2517_v52, 0.0 }
 0x1e0   :  { %273 = vperm.xlu0 %1800, %v2301_v23  }
 0x1ed   :  { %604 = vperm.xlu1 %1801, %v2416_v30  }
 0x1f4   :  { %268 = vperm.xlu2 %1802, %v2299_v22  }
 0x1f5   :  { %619 = vperm.xlu1 %1801, %v2453_v60  }
 0x1fc   :  { %614 = vperm.xlu2 %1802, %v2439_v50  }
 0x1fd   :  { %624 = vperm.xlu1 %1801, %v2470_v9  }
 0x20a   :  { %423 = vadd.xlane.f32.xlu0 %v422_v63  ;;  %v1748_v63 = vld [vmem:[#allocation6] sm:$0xff]  }
 0x20b   :  { %v1749_v45 = vunpack.c.l.bf16 %v1748_v63 }
 0x20d   :  { %vm2554_vm13 = vcmp.gt.f32.partialorder %v1749_v45, 0.0 }
 0x21e   :  { %609 = vperm.xlu0 %1800, %v2427_v40  }
 0x227   :  { %426 = vadd.xlane.f32.xlu1 %v425_v58 }
 0x237   :  { %v412_v53 = vpop.xlane.xlu2 %411 }
 0x238   :  { %1823 = vrcp.f32 %v412_v53  ;;  %vm430_vm7 = vcmp.gt.f32.partialorder %v412_v53, 0.0 }
 0x23e   :  { %v1824_v12 = vpop.eup %1823 }
 0x23f   :  { %v415_v54 = vpop.xlane.xlu0 %414  ;;  %v446_v48 = vsel %vm430_vm7, %v1824_v12, 0.0 }
 0x240   :  { %1825 = vrcp.f32 %v415_v54  ;;  %629 = vperm.xlu1 %1801, %v2478_v16   ;;  %vm431_vm8 = vcmp.gt.f32.partialorder %v415_v54, 0.0  ;;  %v454_v7 = vmul.f32 %v446_v48, %v2437_v49  ;;  %v2564_v58 = vpop.f32.mrf.mxu1 }
 0x246   :  { %v1826_v55 = vpop.eup %1825 }
 0x247   :  { %v447_v56 = vsel %vm431_vm8, %v1826_v55, 0.0  ;;  %v418_v62 = vpop.xlane.xlu1 %417  ;;  %v1750_v55 = vunpack.c.h.bf16 %v1748_v63 }
 0x248   :  { %v455_v61 = vmul.f32 %v447_v56, %v2451_v59  ;;  %1827 = vrcp.f32 %v418_v62  ;;  %1803 = vset.pattern.permute.xlu1 %v2152_v3  ;;  %v1733_v59 = vunpack.c.l.bf16 %v1732_v57  ;;  %vm432_vm10 = vcmp.gt.f32.partialorder %v418_v62, 0.0  ;;  %v2567_v53 = vpop.f32.mrf.mxu1 }
 0x249   :  { %vm2576_vm14 = vcmp.gt.f32.partialorder %v1750_v55, 0.0 }
 0x24a   :  { %v461_v0 = vpack.c.bf16 %v455_v61, %v454_v7  ;;  %vm2536_vm12 = vcmp.gt.f32.partialorder %v1733_v59, 0.0 }
 0x24c   :  { %1591 = vmatmul.msk.bf16.vlgmr.msra.gmra.mxu2 %vm347_vm1, %v461_v0 }
 0x24e   :  { %v1828_v4 = vpop.eup %1827 }
 0x24f   :  { %v421_v2 = vpop.xlane.xlu2 %420  ;;  %v448_v14 = vsel %vm432_vm10, %v1828_v4, 0.0 }
 0x250   :  { %1829 = vrcp.f32 %v421_v2  ;;  %vm433_vm11 = vcmp.gt.f32.partialorder %v421_v2, 0.0  ;;  %v456_v35 = vmul.f32 %v448_v14, %v2468_v8  ;;  %v2551_v8 = vperm.slane %v2341_v38, 1  ;;  %v2571_v54 = vpop.f32.mrf.mxu1  ;;  %v1774_v2 = vld [vmem:[#allocation6 + $0x8] sm:$0xff]  }
 0x252   :  { %v274_v5 = vpop.permute.xlu0 %273 }
 0x253   :  { %v308_v49 = vadd.f32 %v2357_v46, %v274_v5 }
 0x255   :  { %v2532_v6 = vsel %vm2525_vm9, %v308_v49, -1e+30 }
 0x256   :  { %v1830_v27 = vpop.eup %1829  ;;  %v351_v20 = vsel %vm347_vm1, %v2532_v6, -inf }
 0x257   :  { %v449_v29 = vsel %vm433_vm11, %v1830_v27, 0.0  ;;  %v269_v32 = vpop.permute.xlu2 %268  ;;  %352 = vmax.xlane.f32.xlu2 %v351_v20 }
 0x258   :  { %v457_v36 = vmul.f32 %v449_v29, %v2476_v15  ;;  %v307_v37 = vadd.f32 %v2357_v46, %v269_v32  ;;  %v2574_v7 = vpop.f32.mrf.mxu1 }
 0x25a   :  { %v2545_v39 = vsel %vm2536_vm12, %v307_v37, -1e+30  ;;  %v462_v41 = vpack.c.bf16 %v457_v36, %v456_v35 }
 0x25b   :  { %v348_v42 = vsel %vm347_vm1, %v2545_v39, -inf }
 0x25c   :  { %349 = vmax.xlane.f32.xlu0 %v348_v42  ;;  %1592 = vmatmul.msk.bf16.gmra.mxu2 %vm347_vm1, %v462_v41  ;;  %v1775_v41 = vld [vmem:[#allocation6 + $0x10] sm:$0xff]  }
 0x25d   :  { %v1757_v42 = vunpack.c.l.bf16 %v1775_v41 }
 0x25f   :  { %v605_v44 = vpop.permute.xlu1 %604  ;;  %vm2604_vm3 = vcmp.gt.f32.partialorder %v1757_v42, 0.0 }
 0x260   :  { %v643_v15 = vadd.f32 %v2551_v8, %v605_v44 }
 0x262   :  { %v2560_v47 = vsel %vm2554_vm13, %v643_v15, -1e+30  ;;  %v615_v15 = vpop.permute.xlu2 %614 }
 0x263   :  { %v683_v51 = vsel %vm347_vm1, %v2560_v47, -inf  ;;  %v645_v55 = vadd.f32 %v2551_v8, %v615_v15 }
 0x267   :  { %v620_v12 = vpop.permute.xlu1 %619 }
 0x268   :  { %v646_v4 = vadd.f32 %v2551_v8, %v620_v12  ;;  %v1753_v12 = vunpack.c.l.bf16 %v1774_v2 }
 0x26a   :  { %684 = vmax.xlane.f32.xlu1 %v683_v51  ;;  %v1721_v51 = vld [vmem:[%s3074_s7 + $0x30] sm:$0xff]  ;;  %vm2624_vm4 = vcmp.gt.f32.partialorder %v1753_v12, 0.0 }
 0x26f   :  { %634 = vperm.xlu2 %1802, %v2483_v17   ;;  %v625_v0 = vpop.permute.xlu1 %624 }
 0x270   :  { %v647_v63 = vadd.f32 %v2551_v8, %v625_v0  ;;  %v1719_v0 = vld [vmem:[%s3074_s7 + $0x20] sm:$0xff] }
 0x272   :  { %v2610_v45 = vsel %vm2604_vm3, %v647_v63, -1e+30 }
 0x277   :  { %1804 = vset.pattern.permute.xlu2 %v2152_v3  ;;  %v1754_v3 = vunpack.c.h.bf16 %v1774_v2 }
 0x278   :  { %1027 = vperm.xlu2 %1804, %v2567_v53  }
 0x279   :  { %vm2589_vm15 = vcmp.gt.f32.partialorder %v1754_v3, 0.0  ;;  %v2634_v3 = vsel %vm2624_vm4, %v645_v55, -1e+30 }
 0x27a   :  { %v2595_v14 = vsel %vm2589_vm15, %v646_v4, -1e+30 }
 0x27b   :  { %v692_v20 = vsel %vm347_vm1, %v2595_v14, -inf }
 0x27d   :  { %v424_v48 = vpop.xlane.xlu0 %423 }
 0x27e   :  { %1831 = vrcp.f32 %v424_v48  ;;  %vm434_vm0 = vcmp.gt.f32.partialorder %v424_v48, 0.0  ;;  %v1720_v48 = vld [vmem:[%s3074_s7 + $0x28] sm:$0xff] }
 0x283   :  { %1022 = vperm.xlu1 %1803, %v2564_v58  }
 0x284   :  { %v1832_v59 = vpop.eup %1831 }
 0x285   :  { %v450_v27 = vsel %vm434_vm0, %v1832_v59, 0.0  ;;  %v1758_v59 = vunpack.c.h.bf16 %v1775_v41 }
 0x286   :  { %v458_v35 = vmul.f32 %v450_v27, %v2509_v43  ;;  %v695_v43 = vsel %vm347_vm1, %v2610_v45, -inf  ;;  %v1718_v27 = vld [vmem:[%s3074_s7 + $0x18] sm:$0xff] }
 0x287   :  { %vm2643_vm5 = vcmp.gt.f32.partialorder %v1758_v59, 0.0 }
 0x28b   :  { %1032 = vperm.xlu1 %1803, %v2571_v54  }
 0x290   :  { %v610_v56 = vpop.permute.xlu0 %609 }
 0x291   :  { %v644_v62 = vadd.f32 %v2551_v8, %v610_v56 }
 0x293   :  { %1037 = vperm.xlu1 %1803, %v2574_v7   ;;  %v2584_v57 = vsel %vm2576_vm14, %v644_v62, -1e+30 }
 0x294   :  { %v686_v1 = vsel %vm347_vm1, %v2584_v57, -inf }
 0x295   :  { %687 = vmax.xlane.f32.xlu0 %v686_v1 }
 0x29a   :  { %v427_v5 = vpop.xlane.xlu1 %426 }
 0x29b   :  { %1833 = vrcp.f32 %v427_v5  ;;  %vm435_vm2 = vcmp.gt.f32.partialorder %v427_v5, 0.0 }
 0x2a1   :  { %v1834_v29 = vpop.eup %1833  ;;  %693 = vmax.xlane.f32.xlu2 %v692_v20 }
 0x2a2   :  { %v451_v32 = vsel %vm435_vm2, %v1834_v29, 0.0 }
 0x2a3   :  { %v459_v36 = vmul.f32 %v451_v32, %v2517_v52  ;;  %v1722_v52 = vld [vmem:[%s3074_s7 + $0x38] sm:$0xff]  ;;  %v689_v32 = vsel %vm347_vm1, %v2634_v3, -inf }
 0x2a4   :  { %908 = vmatpush.bf16.msrb.mxu2 %v1722_v52  ;;  %v1716_v52 = vld [vmem:[%s3074_s7 + $0x8] sm:$0xff] }
 0x2a5   :  { %v463_v37 = vpack.c.bf16 %v459_v36, %v458_v35 }
 0x2a7   :  { %1593 = vmatmul.msk.bf16.gmra.mxu2 %vm347_vm1, %v463_v37  ;;  %v2654_v37 = vld [vmem:[#allocation6 + $0x18] sm:$0xff]  }
 0x2a8   :  { %909 = vmatpush.bf16.msrb.mxu2 %v1721_v51 }
 0x2a9   :  { %639 = vperm.xlu0 %1800, %v2485_v21  }
 0x2ac   :  { %910 = vmatpush.bf16.msrb.mxu2 %v1720_v48 }
 0x2b0   :  { %911 = vmatpush.bf16.msrb.mxu2 %v1719_v0 }
 0x2b2   :  { %v630_v4 = vpop.permute.xlu1 %629 }
 0x2b4   :  { %912 = vmatpush.bf16.msrb.mxu2 %v1718_v27 }
 0x2bd   :  { %696 = vmax.xlane.f32.xlu1 %v695_v43  ;;  %v1761_v43 = vunpack.c.l.bf16 %v2654_v37 }
 0x2bf   :  { %vm2669_vm6 = vcmp.gt.f32.partialorder %v1761_v43, 0.0 }
 0x2ca   :  { %v353_v56 = vpop.xlane.xlu2 %352 }
 0x2cb   :  { %v373_v1 = vsub.f32 %v2532_v6, %v353_v56  ;;  %v648_v6 = vadd.f32 %v2551_v8, %v630_v4  ;;  %v1715_v56 = vld [vmem:[%s3074_s7] sm:$0xff] }
 0x2cd   :  { %v382_v20 = vmul.f32 1.442695, %v373_v1  ;;  %v2652_v36 = vsel %vm2643_vm5, %v648_v6, -1e+30 }
 0x2ce   :  { %v698_v63 = vsel %vm347_vm1, %v2652_v36, -inf }
 0x2cf   :  { %v350_v2 = vpop.xlane.xlu0 %349 }
 0x2d0   :  { %v372_v5 = vsub.f32 %v2545_v39, %v350_v2  ;;  %v1717_v39 = vld [vmem:[%s3074_s7 + $0x10] sm:$0xff]  ;;  %s2153_s7 = smov 127  }
 0x2d1   :  { %913 = vmatpush.bf16.msrb.mxu2 %v1717_v39  ;;  %v1777_v39 = vld [vmem:[#allocation8 + $0x8] sm:$0xff]  }
 0x2d2   :  { %v380_v29 = vmul.f32 1.442695, %v372_v5  ;;  %v635_v42 = vpop.permute.xlu2 %634  ;;  %v1764_v5 = vld [vmem:[#allocation8] sm:$0xff]  }
 0x2d3   :  { %690 = vmax.xlane.f32.xlu0 %v689_v32  ;;  %v649_v48 = vadd.f32 %v2551_v8, %v635_v42  ;;  %v1765_v27 = vunpack.c.l.bf16 %v1764_v5 }
 0x2d4   :  { %1835 = vpow2.f32 %v380_v29 }
 0x2d5   :  { %1837 = vpow2.f32 %v382_v20  ;;  %914 = vmatpush.bf16.msrb.mxu2 %v1716_v52  ;;  %v2682_v0 = vsel %vm2669_vm6, %v649_v48, -1e+30  ;;  %v1040_v20 = vperm.slane %v2341_v38, 2  ;;  %vm2692_vm7 = vcmp.gt.f32.partialorder %v1765_v27, 0.0 }
 0x2d6   :  { %v701_v2 = vsel %vm347_vm1, %v2682_v0, -inf  ;;  %v1770_v48 = vunpack.c.h.bf16 %v1777_v39 }
 0x2d9   :  { %915 = vmatpush.bf16.msrb.mxu2 %v1715_v56 }
 0x2da   :  { %v1836_v41 = vpop.eup %1835 }
 0x2db   :  { %699 = vmax.xlane.f32.xlu0 %v698_v63  ;;  %v2664_v15 = vsel %vm2536_vm12, %v1836_v41, 0.0  ;;  %v1838_v51 = vpop.eup %1837  ;;  %v1769_v41 = vunpack.c.l.bf16 %v1777_v39 }
 0x2dc   :  { %v404_v12 = vsel %vm347_vm1, %v2664_v15, 0.0  ;;  %v2678_v34 = vsel %vm2525_vm9, %v1838_v51, 0.0  ;;  %916 = vmatmul.bf16.vlgmr.msrb.gmra.mxu2 %v2265_v10  ;;  %vm2719_vm9 = vcmp.gt.f32.partialorder %v1770_v48, 0.0 }
 0x2dd   :  { %405 = vadd.xlane.f32.xlu2 %v404_v12  ;;  %v407_v1 = vsel %vm347_vm1, %v2678_v34, 0.0  ;;  %v685_v4 = vpop.xlane.xlu1 %684  ;;  %vm2702_vm8 = vcmp.gt.f32.partialorder %v1769_v41, 0.0 }
 0x2de   :  { %v707_v11 = vsub.f32 %v2560_v47, %v685_v4 }
 0x2e0   :  { %v715_v59 = vmul.f32 1.442695, %v707_v11  ;;  %v1028_v11 = vpop.permute.xlu2 %1027 }
 0x2e2   :  { %1839 = vpow2.f32 %v715_v59 }
 0x2e3   :  { %408 = vadd.xlane.f32.xlu0 %v407_v1 }
 0x2e5   :  { %702 = vmax.xlane.f32.xlu2 %v701_v2 }
 0x2e8   :  { %v1840_v38 = vpop.eup %1839 }
 0x2e9   :  { %v2708_v43 = vsel %vm2554_vm13, %v1840_v38, 0.0 }
 0x2ea   :  { %v739_v12 = vsel %vm347_vm1, %v2708_v43, 0.0 }
 0x2ec   :  { %921 = vmatmul.bf16.gmra.mxu2 %v2292_v19 }
 0x2f5   :  { %v1023_v29 = vpop.permute.xlu1 %1022 }
 0x2f6   :  { %v1041_v6 = vadd.f32 %v1040_v20, %v1023_v29 }
 0x2f8   :  { %v2698_v10 = vsel %vm2692_vm7, %v1041_v6, -1e+30  ;;  %v1762_v6 = vunpack.c.h.bf16 %v2654_v37 }
 0x2f9   :  { %v1061_v47 = vsel %vm347_vm1, %v2698_v10, -inf }
 0x2fa   :  { %1062 = vmax.xlane.f32.xlu2 %v1061_v47  ;;  %vm2733_vm10 = vcmp.gt.f32.partialorder %v1762_v6, 0.0 }
 0x2fc   :  { %926 = vmatmul.bf16.gmra.mxu2 %v2289_v18 }
 0x2fd   :  { %v1033_v42 = vpop.permute.xlu1 %1032 }
 0x2fe   :  { %v1043_v63 = vadd.f32 %v1040_v20, %v1033_v42  ;;  %v1766_v42 = vunpack.c.h.bf16 %v1764_v5 }
 0x300   :  { %v2712_v52 = vsel %vm2702_vm8, %v1043_v63, -1e+30  ;;  %vm2750_vm11 = vcmp.gt.f32.partialorder %v1766_v42, 0.0 }
 0x301   :  { %v1067_v51 = vsel %vm347_vm1, %v2712_v52, -inf }
 0x302   :  { %1068 = vmax.xlane.f32.xlu1 %v1067_v51  ;;  %740 = vadd.xlane.f32.xlu2 %v739_v12  ;;  %v1042_v51 = vadd.f32 %v1040_v20, %v1028_v11  ;;  %v2767_v11 = vpop.f32.mrf.mxu2 }
 0x304   :  { %v2756_v5 = vsel %vm2750_vm11, %v1042_v51, -1e+30 }
 0x305   :  { %v1038_v56 = vpop.permute.xlu1 %1037 }
 0x306   :  { %v1044_v1 = vadd.f32 %v1040_v20, %v1038_v56  ;;  %v1064_v20 = vsel %vm347_vm1, %v2756_v5, -inf }
 0x308   :  { %v2725_v2 = vsel %vm2719_vm9, %v1044_v1, -1e+30  ;;  %v688_v59 = vpop.xlane.xlu0 %687 }
 0x309   :  { %v1070_v4 = vsel %vm347_vm1, %v2725_v2, -inf  ;;  %v708_v39 = vsub.f32 %v2584_v57, %v688_v59 }
 0x30a   :  { %1071 = vmax.xlane.f32.xlu2 %v1070_v4 }
 0x30c   :  { %931 = vmatmul.bf16.gmra.mxu2 %v2274_v13 }
 0x314   :  { %v694_v27 = vpop.xlane.xlu2 %693 }
 0x315   :  { %v710_v18 = vsub.f32 %v2595_v14, %v694_v27  ;;  %v717_v14 = vmul.f32 1.442695, %v708_v39 }
 0x317   :  { %v721_v29 = vmul.f32 1.442695, %v710_v18  ;;  %v2769_v18 = vpop.f32.mrf.mxu2 }
 0x319   :  { %1841 = vpow2.f32 %v721_v29 }
 0x31a   :  { %1843 = vpow2.f32 %v717_v14 }
 0x31b   :  { %v640_v47 = vpop.permute.xlu0 %639 }
 0x31c   :  { %v650_v38 = vadd.f32 %v2551_v8, %v640_v47 }
 0x31e   :  { %v2740_v63 = vsel %vm2733_vm10, %v650_v38, -1e+30 }
 0x31f   :  { %v1842_v13 = vpop.eup %1841  ;;  %v704_v37 = vsel %vm347_vm1, %v2740_v63, -inf  ;;  %v2777_v6 = vpop.f32.mrf.mxu2 }
 0x320   :  { %705 = vmax.xlane.f32.xlu0 %v704_v37  ;;  %v2746_v57 = vsel %vm2589_vm15, %v1842_v13, 0.0  ;;  %v1844_v49 = vpop.eup %1843 }
 0x321   :  { %v748_v12 = vsel %vm347_vm1, %v2746_v57, 0.0  ;;  %v2762_v48 = vsel %vm2576_vm14, %v1844_v49, 0.0 }
 0x322   :  { %749 = vadd.xlane.f32.xlu1 %v748_v12  ;;  %v742_v56 = vsel %vm347_vm1, %v2762_v48, 0.0 }
 0x327   :  { %v2781_v13 = vpop.f32.mrf.mxu2 }
 0x328   :  { %1065 = vmax.xlane.f32.xlu0 %v1064_v20 }
 0x32f   :  { %v2789_v49 = vpop.f32.mrf.mxu2 }
 0x330   :  { %v697_v1 = vpop.xlane.xlu1 %696  ;;  %743 = vadd.xlane.f32.xlu0 %v742_v56 }
 0x331   :  { %v711_v4 = vsub.f32 %v2610_v45, %v697_v1 }
 0x333   :  { %v723_v59 = vmul.f32 1.442695, %v711_v4 }
 0x335   :  { %1845 = vpow2.f32 %v723_v59 }
 0x33b   :  { %v1846_v27 = vpop.eup %1845 }
 0x33c   :  { %v2773_v29 = vsel %vm2604_vm3, %v1846_v27, 0.0 }
 0x33d   :  { %v751_v61 = vsel %vm347_vm1, %v2773_v29, 0.0 }
 0x33e   :  { %752 = vadd.xlane.f32.xlu2 %v751_v61 }
 0x346   :  { %v691_v39 = vpop.xlane.xlu0 %690 }
 0x347   :  { %v709_v45 = vsub.f32 %v2634_v3, %v691_v39 }
 0x349   :  { %v719_v47 = vmul.f32 1.442695, %v709_v45 }
 0x34b   :  { %1847 = vpow2.f32 %v719_v47 }
 0x34e   :  { %v700_v38 = vpop.xlane.xlu0 %699 }
 0x34f   :  { %v712_v42 = vsub.f32 %v2652_v36, %v700_v38  ;;  %v2800_v38 = vpop.f32.mrf.mxu2 }
 0x350   :  { %v406_v14 = vpop.xlane.xlu2 %405 }
 0x351   :  { %v1848_v44 = vpop.eup %1847  ;;  %v725_v37 = vmul.f32 1.442695, %v712_v42  ;;  %1849 = vrcp.f32 %v406_v14  ;;  %vm428_vm12 = vcmp.gt.f32.partialorder %v406_v14, 0.0 }
 0x352   :  { %v2785_v51 = vsel %vm2624_vm4, %v1848_v44, 0.0 }
 0x353   :  { %1851 = vpow2.f32 %v725_v37  ;;  %v745_v12 = vsel %vm347_vm1, %v2785_v51, 0.0 }
 0x354   :  { %746 = vadd.xlane.f32.xlu0 %v745_v12 }
 0x356   :  { %v409_v3 = vpop.xlane.xlu0 %408 }
 0x357   :  { %1853 = vrcp.f32 %v409_v3  ;;  %v1850_v20 = vpop.eup %1849  ;;  %vm429_vm13 = vcmp.gt.f32.partialorder %v409_v3, 0.0 }
 0x358   :  { %v703_v36 = vpop.xlane.xlu2 %702  ;;  %v444_v27 = vsel %vm428_vm12, %v1850_v20, 0.0 }
 0x359   :  { %v1852_v56 = vpop.eup %1851  ;;  %v713_v1 = vsub.f32 %v2682_v0, %v703_v36  ;;  %v452_v45 = vmul.f32 %v444_v27, %v2664_v15 }
 0x35a   :  { %v2794_v4 = vsel %vm2643_vm5, %v1852_v56, 0.0 }
 0x35b   :  { %v727_v62 = vmul.f32 1.442695, %v713_v1  ;;  %v754_v59 = vsel %vm347_vm1, %v2794_v4, 0.0 }
 0x35c   :  { %755 = vadd.xlane.f32.xlu0 %v754_v59 }
 0x35d   :  { %v1854_v61 = vpop.eup %1853  ;;  %1855 = vpow2.f32 %v727_v62 }
 0x35e   :  { %v445_v39 = vsel %vm429_vm13, %v1854_v61, 0.0 }
 0x35f   :  { %v453_v47 = vmul.f32 %v445_v39, %v2678_v34  ;;  %v2809_v44 = vpop.f32.mrf.mxu2 }
 0x361   :  { %v460_v0 = vpack.c.bf16 %v453_v47, %v452_v45 }
 0x363   :  { %v1856_v35 = vpop.eup %1855  ;;  %1590 = vmatmul.msk.bf16.vlgmr.msrb.gmra.mxu0 %vm347_vm1, %v460_v0 }
 0x364   :  { %v2805_v42 = vsel %vm2669_vm6, %v1856_v35, 0.0 }
 0x365   :  { %v757_v14 = vsel %vm347_vm1, %v2805_v42, 0.0 }
 0x366   :  { %758 = vadd.xlane.f32.xlu1 %v757_v14 }
 0x367   :  { %v2812_v12 = vpop.f32.mrf.mxu2 }
 0x36d   :  { %v1063_v37 = vpop.xlane.xlu2 %1062 }
 0x36e   :  { %v1073_v15 = vsub.f32 %v2698_v10, %v1063_v37 }
 0x36f   :  { %v922_v62 = vpop.f32.mrf.mxu2 }
 0x370   :  { %v1077_v34 = vmul.f32 1.442695, %v1073_v15 }
 0x372   :  { %1857 = vpow2.f32 %v1077_v34 }
 0x375   :  { %v741_v3 = vpop.xlane.xlu2 %740  ;;  %v1069_v45 = vpop.xlane.xlu1 %1068 }
 0x376   :  { %v1075_v0 = vsub.f32 %v2712_v52, %v1069_v45  ;;  %vm763_vm14 = vcmp.gt.f32.partialorder %v741_v3, 0.0 }
 0x377   :  { %v924_v10 = vpop.f32.mrf.mxu2 }
 0x378   :  { %v1858_v20 = vpop.eup %1857  ;;  %v1081_v37 = vmul.f32 1.442695, %v1075_v0 }
 0x379   :  { %v2816_v55 = vsel %vm2692_vm7, %v1858_v20, 0.0 }
 0x37a   :  { %v1089_v36 = vsel %vm347_vm1, %v2816_v55, 0.0 }
 0x37b   :  { %1090 = vadd.xlane.f32.xlu0 %v1089_v36 }
 0x37d   :  { %v1072_v56 = vpop.xlane.xlu2 %1071 }
 0x37e   :  { %v1076_v1 = vsub.f32 %v2725_v2, %v1072_v56 }
 0x37f   :  { %v927_v39 = vpop.f32.mrf.mxu2 }
 0x380   :  { %v1083_v59 = vmul.f32 1.442695, %v1076_v1 }
 0x382   :  { %1859 = vpow2.f32 %v1083_v59 }
 0x387   :  { %v929_v14 = vpop.f32.mrf.mxu2 }
 0x388   :  { %v1860_v27 = vpop.eup %1859 }
 0x389   :  { %v2823_v61 = vsel %vm2719_vm9, %v1860_v27, 0.0 }
 0x38a   :  { %v1098_v32 = vsel %vm347_vm1, %v2823_v61, 0.0 }
 0x38b   :  { %1099 = vadd.xlane.f32.xlu0 %v1098_v32 }
 0x38f   :  { %v932_v36 = vpop.f32.mrf.mxu2 }
 0x393   :  { %v706_v47 = vpop.xlane.xlu0 %705 }
 0x394   :  { %v714_v2 = vsub.f32 %v2740_v63, %v706_v47 }
 0x396   :  { %v729_v35 = vmul.f32 1.442695, %v714_v2 }
 0x397   :  { %v934_v32 = vpop.f32.mrf.mxu2 }
 0x398   :  { %1861 = vpow2.f32 %v729_v35  ;;  %v1122_v45 = vpack.c.bf16 %v934_v32, %v932_v36  ;;  %v1121_v35 = vpack.c.bf16 %v929_v14, %v927_v39 }
 0x399   :  { %1863 = vpow2.f32 %v1081_v37 }
 0x39a   :  { %1865 = vrcp.f32 %v741_v3  ;;  %1133 = vmatpush.bf16.msrb.mxu3 %v1122_v45 }
 0x39b   :  { %v1066_v15 = vpop.xlane.xlu0 %1065 }
 0x39c   :  { %v1074_v46 = vsub.f32 %v2756_v5, %v1066_v15 }
 0x39e   :  { %v1862_v34 = vpop.eup %1861  ;;  %v1079_v20 = vmul.f32 1.442695, %v1074_v46  ;;  %v1120_v46 = vpack.c.bf16 %v924_v10, %v922_v62  ;;  %1134 = vmatpush.bf16.msrb.mxu3 %v1121_v35 }
 0x39f   :  { %1160 = vrot.lane.b32.xlu0 %v2767_v11, %s2153_s7  ;;  %v2834_v52 = vsel %vm2733_vm10, %v1862_v34, 0.0  ;;  %v1864_v56 = vpop.eup %1863  ;;  %v1119_v34 = vpack.c.bf16 %v2812_v12, %v2809_v44 }
 0x3a0   :  { %1867 = vpow2.f32 %v1079_v20  ;;  %v760_v63 = vsel %vm347_vm1, %v2834_v52, 0.0  ;;  %v1866_v5 = vpop.eup %1865  ;;  %v2840_v59 = vsel %vm2702_vm8, %v1864_v56, 0.0  ;;  %v750_v20 = vpop.xlane.xlu1 %749 }
 0x3a1   :  { %761 = vadd.xlane.f32.xlu2 %v760_v63  ;;  %v1095_v47 = vsel %vm347_vm1, %v2840_v59, 0.0  ;;  %v779_v2 = vsel %vm763_vm14, %v1866_v5, 0.0  ;;  %vm766_vm0 = vcmp.gt.f32.partialorder %v750_v20, 0.0 }
 0x3a2   :  { %v787_v8 = vmul.f32 %v779_v2, %v2708_v43  ;;  %1135 = vmatpush.bf16.msrb.mxu3 %v1120_v46 }
 0x3a3   :  { %v744_v1 = vpop.xlane.xlu0 %743 }
 0x3a4   :  { %1869 = vrcp.f32 %v744_v1  ;;  %vm764_vm15 = vcmp.gt.f32.partialorder %v744_v1, 0.0 }
 0x3a5   :  { %1871 = vrcp.f32 %v750_v20 }
 0x3a6   :  { %v1868_v27 = vpop.eup %1867  ;;  %1136 = vmatpush.bf16.msrb.mxu3 %v1119_v34 }
 0x3a7   :  { %v2844_v41 = vsel %vm2750_vm11, %v1868_v27, 0.0 }
 0x3a8   :  { %v1092_v0 = vsel %vm347_vm1, %v2844_v41, 0.0 }
 0x3a9   :  { %1096 = vadd.xlane.f32.xlu2 %v1095_v47  ;;  %1093 = vadd.xlane.f32.xlu1 %v1092_v0 }
 0x3aa   :  { %v1870_v19 = vpop.eup %1869 }
 0x3ab   :  { %v780_v37 = vsel %vm764_vm15, %v1870_v19, 0.0  ;;  %v1872_v39 = vpop.eup %1871 }
 0x3ac   :  { %v788_v15 = vmul.f32 %v780_v37, %v2762_v48  ;;  %v782_v14 = vsel %vm766_vm0, %v1872_v39, 0.0 }
 0x3ad   :  { %v790_v10 = vmul.f32 %v782_v14, %v2746_v57 }
 0x3ae   :  { %v795_v3 = vpack.c.bf16 %v788_v15, %v787_v8 }
 0x3b0   :  { %1626 = vmatmul.msk.bf16.vlgmr.msra.gmra.mxu0 %vm347_vm1, %v795_v3 }
 0x3b1   :  { %v753_v56 = vpop.xlane.xlu2 %752 }
 0x3b2   :  { %vm767_vm4 = vcmp.gt.f32.partialorder %v753_v56, 0.0 }
 0x3c7   :  { %v747_v36 = vpop.xlane.xlu0 %746 }
 0x3c8   :  { %1873 = vrcp.f32 %v747_v36  ;;  %vm765_vm2 = vcmp.gt.f32.partialorder %v747_v36, 0.0 }
 0x3ce   :  { %v1874_v43 = vpop.eup %1873 }
 0x3cf   :  { %v781_v48 = vsel %vm765_vm2, %v1874_v43, 0.0  ;;  %v756_v62 = vpop.xlane.xlu0 %755 }
 0x3d0   :  { %v789_v63 = vmul.f32 %v781_v48, %v2785_v51  ;;  %1875 = vrcp.f32 %v756_v62  ;;  %vm768_vm3 = vcmp.gt.f32.partialorder %v756_v62, 0.0 }
 0x3d1   :  { %1877 = vrcp.f32 %v753_v56 }
 0x3d2   :  { %v796_v44 = vpack.c.bf16 %v790_v10, %v789_v63 }
 0x3d4   :  { %1627 = vmatmul.msk.bf16.gmra.mxu0 %vm347_vm1, %v796_v44 }
 0x3d6   :  { %v1876_v12 = vpop.eup %1875 }
 0x3d7   :  { %v1878_v1 = vpop.eup %1877  ;;  %v784_v5 = vsel %vm768_vm3, %v1876_v12, 0.0 }
 0x3d8   :  { %v783_v27 = vsel %vm767_vm4, %v1878_v1, 0.0  ;;  %v792_v32 = vmul.f32 %v784_v5, %v2794_v4 }
 0x3d9   :  { %v791_v45 = vmul.f32 %v783_v27, %v2773_v29  ;;  %v759_v0 = vpop.xlane.xlu1 %758 }
 0x3da   :  { %1879 = vrcp.f32 %v759_v0  ;;  %vm769_vm5 = vcmp.gt.f32.partialorder %v759_v0, 0.0 }
 0x3db   :  { %v797_v57 = vpack.c.bf16 %v792_v32, %v791_v45  ;;  %v2154_v45 = vmov 125  }
 0x3dc   :  { %1805 = vset.pattern.permute.xlu0 %v2154_v45  ;;  %1806 = vset.pattern.permute.xlu2 %v2154_v45 }
 0x3dd   :  { %1807 = vset.pattern.permute.xlu1 %v2154_v45 }
 0x3e0   :  { %v2860_v47 = vpop.f32.mrf.mxu0  ;;  %v1880_v4 = vpop.eup %1879 }
 0x3e1   :  { %1156 = vrot.lane.b32.xlu1 %v2860_v47, %s2153_s7  ;;  %v785_v29 = vsel %vm769_vm5, %v1880_v4, 0.0 }
 0x3e2   :  { %v793_v15 = vmul.f32 %v785_v29, %v2805_v42  ;;  %v2916_v29 = vstv %s1188_s28  ;;  %s1533_s28 = sshll.u32 %s3079_s12, 4  ;;  %s1520_s12 = sshll.u32 %s3078_s11, 4  ;;  %s1534_s28 = int_to_ptr.hbm [resolvable:$true] %s1533_s28  ;;  %s1521_s12 = int_to_ptr.hbm [resolvable:$true] %s1520_s12 }
 0x3e4   :  { %1628 = vmatmul.msk.bf16.gmra.mxu0 %vm347_vm1, %v797_v57 }
 0x3e8   :  { %v2865_v51 = vpop.f32.mrf.mxu0 }
 0x3e9   :  { %1158 = vrot.lane.b32.xlu2 %v2865_v51, %s2153_s7 }
 0x3ee   :  { %v1091_v19 = vpop.xlane.xlu0 %1090 }
 0x3ef   :  { %vm1101_vm7 = vcmp.gt.f32.partialorder %v1091_v19, 0.0 }
 0x3fe   :  { %v1100_v62 = vpop.xlane.xlu0 %1099 }
 0x3ff   :  { %vm1104_vm10 = vcmp.gt.f32.partialorder %v1100_v62, 0.0 }
 0x414   :  { %v762_v2 = vpop.xlane.xlu2 %761 }
 0x415   :  { %1881 = vrcp.f32 %v762_v2  ;;  %vm770_vm6 = vcmp.gt.f32.partialorder %v762_v2, 0.0  ;;  %v2913_v2 = vstv %s1696_s27 }
 0x416   :  { %1883 = vrcp.f32 %v1091_v19 }
 0x41b   :  { %v1882_v35 = vpop.eup %1881 }
 0x41c   :  { %v786_v37 = vsel %vm770_vm6, %v1882_v35, 0.0  ;;  %v1094_v8 = vpop.xlane.xlu1 %1093  ;;  %v1884_v34 = vpop.eup %1883 }
 0x41d   :  { %v794_v46 = vmul.f32 %v786_v37, %v2834_v52  ;;  %1885 = vrcp.f32 %v1094_v8  ;;  %v1109_v20 = vsel %vm1101_vm7, %v1884_v34, 0.0  ;;  %vm1102_vm8 = vcmp.gt.f32.partialorder %v1094_v8, 0.0  ;;  %v1097_v39 = vpop.xlane.xlu2 %1096 }
 0x41e   :  { %v1113_v43 = vmul.f32 %v1109_v20, %v2816_v55  ;;  %1887 = vrcp.f32 %v1097_v39  ;;  %vm1103_vm9 = vcmp.gt.f32.partialorder %v1097_v39, 0.0 }
 0x41f   :  { %v798_v3 = vpack.c.bf16 %v794_v46, %v793_v15  ;;  %1889 = vrcp.f32 %v1100_v62 }
 0x421   :  { %1629 = vmatmul.msk.bf16.gmra.mxu0 %vm347_vm1, %v798_v3 }
 0x423   :  { %v1886_v36 = vpop.eup %1885 }
 0x424   :  { %v1110_v14 = vsel %vm1102_vm8, %v1886_v36, 0.0  ;;  %v1888_v10 = vpop.eup %1887 }
 0x425   :  { %v1114_v48 = vmul.f32 %v1110_v14, %v2844_v41  ;;  %v1890_v63 = vpop.eup %1889  ;;  %v1111_v56 = vsel %vm1103_vm9, %v1888_v10, 0.0 }
 0x426   :  { %v1112_v44 = vsel %vm1104_vm10, %v1890_v63, 0.0  ;;  %v1115_v55 = vmul.f32 %v1111_v56, %v2840_v59 }
 0x427   :  { %v1117_v42 = vpack.c.bf16 %v1114_v48, %v1113_v43  ;;  %v1116_v12 = vmul.f32 %v1112_v44, %v2823_v61 }
 0x429   :  { %1694 = vmatmul.msk.bf16.vlgmr.msrb.gmra.mxu3 %vm347_vm1, %v1117_v42  ;;  %v1118_v1 = vpack.c.bf16 %v1116_v12, %v1115_v55 }
 0x42d   :  { %v2875_v52 = vpop.f32.mrf.mxu0 }
 0x42e   :  { %1206 = vrot.lane.b32.xlu2 %v2875_v52, %s2153_s7 }
 0x435   :  { %v2880_v41 = vpop.f32.mrf.mxu0 }
 0x436   :  { %1208 = vrot.lane.b32.xlu1 %v2880_v41, %s2153_s7 }
 0x439   :  { %1695 = vmatmul.msk.bf16.gmra.mxu3 %vm347_vm1, %v1118_v1 }
 0x43e   :  { %1162 = vrot.lane.b32.xlu1 %v2769_v18, %s2153_s7 }
 0x443   :  { %v1159_v32 = vpop.permute.xlu2 %1158 }
 0x444   :  { %v1181_v62 = vadd.f32 %v1159_v32, %v2301_v23 }
 0x446   :  { %v1191_v63 = vadd.f32 %v2916_v29, %v1181_v62 }
 0x451   :  { %v2888_v5 = vpop.f32.mrf.mxu0 }
 0x452   :  { %1210 = vrot.lane.b32.xlu0 %v2888_v5, %s2153_s7 }
 0x453   :  { %v1157_v57 = vpop.permute.xlu1 %1156 }
 0x454   :  { %v1180_v0 = vadd.f32 %v1157_v57, %v2299_v22 }
 0x456   :  { %v1190_v35 = vadd.f32 %v2916_v29, %v1180_v0 }
 0x459   :  { %v2892_v27 = vpop.f32.mrf.mxu0 }
 0x45a   :  { %1164 = vrot.lane.b32.xlu0 %v2777_v6, %s2153_s7  ;;  %1212 = vrot.lane.b32.xlu2 %v2892_v27, %s2153_s7 }
 0x461   :  { %v2898_v61 = vpop.f32.mrf.mxu0 }
 0x462   :  { %1170 = vrot.lane.b32.xlu0 %v2800_v38, %s2153_s7  ;;  %1166 = vrot.lane.b32.xlu2 %v2781_v13, %s2153_s7 }
 0x463   :  { %1214 = vrot.lane.b32.xlu1 %v2898_v61, %s2153_s7 }
 0x469   :  { %v2906_v59 = vpop.f32.mrf.mxu0 }
 0x46a   :  { %1216 = vrot.lane.b32.xlu0 %v2906_v59, %s2153_s7 }
 0x46b   :  { %1168 = vrot.lane.b32.xlu1 %v2789_v49, %s2153_s7 }
 0x488   :  { %v1207_v4 = vpop.permute.xlu2 %1206 }
 0x489   :  { %v1230_v19 = vadd.f32 %v1207_v4, %v2416_v30 }
 0x48b   :  { %v1240_v37 = vadd.f32 %v2913_v2, %v1230_v19 }
 0x48d   :  { %v1248_v8 = vmax.f32 %v1190_v35, %v1240_v37 }
 0x48f   :  { %v1256_v15 = vsub.f32 %v1190_v35, %v1248_v8  ;;  %v1280_v46 = vsub.f32 %v1240_v37, %v1248_v8 }
 0x491   :  { %v1264_v3 = vmul.f32 1.442695, %v1256_v15  ;;  %v1288_v34 = vmul.f32 1.442695, %v1280_v46 }
 0x493   :  { %1891 = vpow2.f32 %v1264_v3 }
 0x494   :  { %1893 = vpow2.f32 %v1288_v34 }
 0x499   :  { %v1892_v20 = vpop.eup %1891 }
 0x49a   :  { %v1894_v22 = vpop.eup %1893 }
 0x49b   :  { %v1304_v36 = vadd.f32 %v1894_v22, %v1892_v20 }
 0x49d   :  { %1895 = vrcp.f32 %v1304_v36 }
 0x49e   :  { %v2920_v39 = vpop.f32.mrf.mxu0 }
 0x49f   :  { %1218 = vrot.lane.b32.xlu2 %v2920_v39, %s2153_s7 }
 0x4a3   :  { %v1896_v30 = vpop.eup %1895 }
 0x4a4   :  { %v1320_v14 = vmul.f32 %v1896_v30, %v1892_v20  ;;  %v2924_v43 = vmul.f32 %v1896_v30, %v1894_v22  ;;  %v1161_v20 = vpop.permute.xlu0 %1160 }
 0x4a5   :  { %v1182_v30 = vadd.f32 %v1161_v20, %v2303_v24 }
 0x4a6   :  { %1330 = vperm.xlu0 %1805, %v1320_v14   ;;  %v2926_v48 = vpop.f32.mrf.mxu0 }
 0x4a7   :  { %1220 = vrot.lane.b32.xlu1 %v2926_v48, %s2153_s7 }
 0x4a8   :  { %v1209_v42 = vpop.permute.xlu1 %1208 }
 0x4a9   :  { %v1231_v10 = vadd.f32 %v1209_v42, %v2427_v40 }
 0x4ab   :  { %v1241_v56 = vadd.f32 %v2913_v2, %v1231_v10 }
 0x4ac   :  { %v2934_v55 = vpop.f32.mrf.mxu3 }
 0x4ad   :  { %v1249_v44 = vmax.f32 %v1191_v63, %v1241_v56 }
 0x4af   :  { %v1257_v12 = vsub.f32 %v1191_v63, %v1249_v44  ;;  %v1281_v1 = vsub.f32 %v1241_v56, %v1249_v44  ;;  %1460 = vrot.lane.b32.xlu1 %v2934_v55, %s2155_s13 }
 0x4b0   :  { %v1163_v23 = vpop.permute.xlu1 %1162 }
 0x4b1   :  { %v1266_v32 = vmul.f32 1.442695, %v1257_v12  ;;  %v1290_v45 = vmul.f32 1.442695, %v1281_v1  ;;  %v1183_v57 = vadd.f32 %v1163_v23, %v2306_v25  ;;  %v1192_v12 = vadd.f32 %v2916_v29, %v1182_v30 }
 0x4b3   :  { %1897 = vpow2.f32 %v1266_v32  ;;  %v1193_v19 = vadd.f32 %v2916_v29, %v1183_v57 }
 0x4b4   :  { %1899 = vpow2.f32 %v1290_v45  ;;  %v1213_v40 = vpop.permute.xlu2 %1212  ;;  %v2939_v0 = vpop.f32.mrf.mxu3 }
 0x4b5   :  { %v1233_v4 = vadd.f32 %v1213_v40, %v2453_v60 }
 0x4b7   :  { %v1243_v35 = vadd.f32 %v2913_v2, %v1233_v4 }
 0x4b9   :  { %v1898_v37 = vpop.eup %1897  ;;  %v1251_v8 = vmax.f32 %v1193_v19, %v1243_v35 }
 0x4ba   :  { %v1900_v15 = vpop.eup %1899 }
 0x4bb   :  { %v1259_v46 = vsub.f32 %v1193_v19, %v1251_v8  ;;  %v1283_v3 = vsub.f32 %v1243_v35, %v1251_v8  ;;  %v1305_v34 = vadd.f32 %v1900_v15, %v1898_v37 }
 0x4bc   :  { %v2944_v25 = vpop.f32.mrf.mxu3  ;;  %v1167_v20 = vpop.permute.xlu2 %1166 }
 0x4bd   :  { %v1270_v22 = vmul.f32 1.442695, %v1259_v46  ;;  %v1294_v36 = vmul.f32 1.442695, %v1283_v3  ;;  %1901 = vrcp.f32 %v1305_v34  ;;  %1464 = vrot.lane.b32.xlu1 %v2944_v25, %s2155_s13  ;;  %v1185_v30 = vadd.f32 %v1167_v20, %v2315_v28 }
 0x4bf   :  { %1903 = vpow2.f32 %v1270_v22 }
 0x4c0   :  { %1905 = vpow2.f32 %v1294_v36 }
 0x4c3   :  { %v1902_v60 = vpop.eup %1901 }
 0x4c4   :  { %v1211_v14 = vpop.permute.xlu0 %1210  ;;  %v1321_v62 = vmul.f32 %v1902_v60, %v1898_v37  ;;  %v2949_v42 = vmul.f32 %v1902_v60, %v1900_v15  ;;  %v2951_v63 = vpop.f32.mrf.mxu3 }
 0x4c5   :  { %v1904_v10 = vpop.eup %1903  ;;  %v1232_v56 = vadd.f32 %v1211_v14, %v2439_v50  ;;  %1466 = vrot.lane.b32.xlu0 %v2951_v63, %s2155_s13 }
 0x4c6   :  { %v2954_v44 = vpop.eup %1905  ;;  %1335 = vperm.xlu2 %1806, %v1321_v62  }
 0x4c7   :  { %v1242_v1 = vadd.f32 %v2913_v2, %v1232_v56  ;;  %v1307_v24 = vadd.f32 %v2954_v44, %v1904_v10 }
 0x4c9   :  { %v1250_v23 = vmax.f32 %v1192_v12, %v1242_v1  ;;  %1907 = vrcp.f32 %v1307_v24 }
 0x4cb   :  { %v1258_v32 = vsub.f32 %v1192_v12, %v1250_v23  ;;  %v1282_v45 = vsub.f32 %v1242_v1, %v1250_v23 }
 0x4cc   :  { %v1165_v57 = vpop.permute.xlu0 %1164 }
 0x4cd   :  { %v1268_v40 = vmul.f32 1.442695, %v1258_v32  ;;  %v1292_v4 = vmul.f32 1.442695, %v1282_v45  ;;  %v1184_v35 = vadd.f32 %v1165_v57, %v2309_v26 }
 0x4cf   :  { %v2961_v50 = vpop.eup %1907  ;;  %1909 = vpow2.f32 %v1268_v40  ;;  %v1194_v22 = vadd.f32 %v2916_v29, %v1184_v35 }
 0x4d0   :  { %1911 = vpow2.f32 %v1292_v4  ;;  %v1323_v19 = vmul.f32 %v2961_v50, %v1904_v10 }
 0x4d2   :  { %1345 = vperm.xlu1 %1807, %v1323_v19  }
 0x4d4   :  { %v2965_v37 = vpop.permute.xlu0 %1170 }
 0x4d5   :  { %v1910_v8 = vpop.eup %1909  ;;  %v1215_v15 = vpop.permute.xlu1 %1214 }
 0x4d6   :  { %v1912_v46 = vpop.eup %1911  ;;  %v1234_v3 = vadd.f32 %v1215_v15, %v2470_v9  ;;  %v1195_v9 = vadd.f32 %v2916_v29, %v1185_v30 }
 0x4d7   :  { %v1306_v34 = vadd.f32 %v1912_v46, %v1910_v8 }
 0x4d8   :  { %v1244_v36 = vadd.f32 %v2913_v2, %v1234_v3 }
 0x4d9   :  { %1913 = vrcp.f32 %v1306_v34 }
 0x4da   :  { %v1252_v60 = vmax.f32 %v1194_v22, %v1244_v36 }
 0x4dc   :  { %v1260_v14 = vsub.f32 %v1194_v22, %v1252_v60  ;;  %v1284_v62 = vsub.f32 %v1244_v36, %v1252_v60  ;;  %v1217_v26 = vpop.permute.xlu0 %1216 }
 0x4dd   :  { %v1235_v10 = vadd.f32 %v1217_v26, %v2478_v16  ;;  %v1169_v20 = vpop.permute.xlu1 %1168 }
 0x4de   :  { %v1272_v56 = vmul.f32 1.442695, %v1260_v14  ;;  %v1296_v12 = vmul.f32 1.442695, %v1284_v62  ;;  %v1186_v36 = vadd.f32 %v1169_v20, %v2324_v31  ;;  %v1387_v31 = vmul.f32 %v2961_v50, %v2954_v44 }
 0x4df   :  { %v1914_v1 = vpop.eup %1913  ;;  %v1245_v24 = vadd.f32 %v2913_v2, %v1235_v10 }
 0x4e0   :  { %1915 = vpow2.f32 %v1272_v56  ;;  %v1322_v23 = vmul.f32 %v1914_v1, %v1910_v8  ;;  %v2974_v32 = vmul.f32 %v1914_v1, %v1912_v46  ;;  %v1196_v26 = vadd.f32 %v2916_v29, %v1186_v36 }
 0x4e1   :  { %1917 = vpow2.f32 %v1296_v12  ;;  %v1253_v45 = vmax.f32 %v1195_v9, %v1245_v24 }
 0x4e2   :  { %1340 = vperm.xlu2 %1806, %v1322_v23  }
 0x4e3   :  { %v1261_v28 = vsub.f32 %v1195_v9, %v1253_v45  ;;  %v1285_v57 = vsub.f32 %v1245_v24, %v1253_v45 }
 0x4e5   :  { %v1274_v40 = vmul.f32 1.442695, %v1261_v28  ;;  %v1298_v4 = vmul.f32 1.442695, %v1285_v57 }
 0x4e6   :  { %v1916_v19 = vpop.eup %1915 }
 0x4e7   :  { %v1918_v16 = vpop.eup %1917  ;;  %1919 = vpow2.f32 %v1274_v40 }
 0x4e8   :  { %1921 = vpow2.f32 %v1298_v4  ;;  %v1308_v35 = vadd.f32 %v1918_v16, %v1916_v19  ;;  %v1187_v4 = vadd.f32 %v2965_v37, %v2330_v33 }
 0x4ea   :  { %1462 = vrot.lane.b32.xlu2 %v2939_v0, %s2155_s13  ;;  %1923 = vrcp.f32 %v1308_v35  ;;  %v1197_v35 = vadd.f32 %v2916_v29, %v1187_v4  ;;  %v1940_v4 = vld [vmem:[%s3067_s0 + $0x18] sm:$0xff] }
 0x4ed   :  { %v1920_v15 = vpop.eup %1919 }
 0x4ee   :  { %v1922_v8 = vpop.eup %1921 }
 0x4ef   :  { %v1309_v46 = vadd.f32 %v1922_v8, %v1920_v15 }
 0x4f0   :  { %v1924_v3 = vpop.eup %1923 }
 0x4f1   :  { %v1324_v34 = vmul.f32 %v1924_v3, %v1916_v19  ;;  %1925 = vrcp.f32 %v1309_v46  ;;  %v2156_v46 = vmov 1  }
 0x4f3   :  { %1350 = vperm.xlu0 %1805, %v1324_v34  }
 0x4f7   :  { %v1926_v22 = vpop.eup %1925 }
 0x4f8   :  { %v1325_v60 = vmul.f32 %v1926_v22, %v1920_v15  ;;  %v2979_v30 = vmul.f32 %v1926_v22, %v1922_v8  ;;  %v1388_v22 = vmul.f32 %v1924_v3, %v1918_v16 }
 0x4f9   :  { %v1219_v14 = vpop.permute.xlu2 %1218 }
 0x4fa   :  { %1355 = vperm.xlu2 %1806, %v1325_v60   ;;  %v1236_v62 = vadd.f32 %v1219_v14, %v2483_v17 }
 0x4fc   :  { %v1246_v10 = vadd.f32 %v2913_v2, %v1236_v62 }
 0x4fe   :  { %v1254_v56 = vmax.f32 %v1196_v26, %v1246_v10 }
 0x500   :  { %v1262_v12 = vsub.f32 %v1196_v26, %v1254_v56  ;;  %v1286_v1 = vsub.f32 %v1246_v10, %v1254_v56  ;;  %v1477_v10 = vstv %s1697_s8 }
 0x502   :  { %v1276_v9 = vmul.f32 1.442695, %v1262_v12  ;;  %v1300_v24 = vmul.f32 1.442695, %v1286_v1  ;;  %1394 = vperm.xlu2 %1806, %v2924_v43  }
 0x504   :  { %1927 = vpow2.f32 %v1276_v9 }
 0x505   :  { %1929 = vpow2.f32 %v1300_v24 }
 0x50a   :  { %v1928_v23 = vpop.eup %1927  ;;  %1409 = vperm.xlu2 %1806, %v1387_v31  }
 0x50b   :  { %v1930_v45 = vpop.eup %1929 }
 0x50c   :  { %v1310_v17 = vadd.f32 %v1930_v45, %v1928_v23 }
 0x50e   :  { %1931 = vrcp.f32 %v1310_v17 }
 0x514   :  { %v1932_v28 = vpop.eup %1931 }
 0x515   :  { %v1390_v57 = vmul.f32 %v1932_v28, %v1930_v45  ;;  %v1326_v40 = vmul.f32 %v1932_v28, %v1928_v23 }
 0x517   :  { %1424 = vperm.xlu2 %1806, %v1390_v57   ;;  %1360 = vperm.xlu1 %1807, %v1326_v40  }
 0x518   :  { %v1331_v3 = vpop.permute.xlu0 %1330 }
 0x519   :  { %v1221_v19 = vpop.permute.xlu1 %1220  ;;  %v1368_v45 = vmul.f32 %v1331_v3, %v2860_v47 }
 0x51a   :  { %v1237_v43 = vadd.f32 %v1221_v19, %v2485_v21 }
 0x51c   :  { %v1247_v44 = vadd.f32 %v2913_v2, %v1237_v43 }
 0x51e   :  { %v1255_v50 = vmax.f32 %v1197_v35, %v1247_v44 }
 0x51f   :  { %1399 = vperm.xlu1 %1807, %v2949_v42   ;;  %1809 = vset.pattern.permute.xlu2 %v2156_v46 }
 0x520   :  { %v1263_v15 = vsub.f32 %v1197_v35, %v1255_v50  ;;  %v1287_v8 = vsub.f32 %v1247_v44, %v1255_v50  ;;  %v1336_v2 = vpop.permute.xlu2 %1335 }
 0x521   :  { %v1461_v29 = vpop.permute.xlu1 %1460 }
 0x522   :  { %v1278_v34 = vmul.f32 1.442695, %v1263_v15  ;;  %v1302_v20 = vmul.f32 1.442695, %v1287_v8  ;;  %v1472_v24 = vadd.f32 %v1461_v29, %v2564_v58  ;;  %v1369_v8 = vmul.f32 %v1336_v2, %v2865_v51  ;;  %v1943_v51 = vld [vmem:[%s3067_s0 + $0x20] sm:$0xff] }
 0x524   :  { %1933 = vpow2.f32 %v1278_v34  ;;  %v1478_v31 = vadd.f32 %v1477_v10, %v1472_v24  ;;  %v1947_v24 = vld [vmem:[%s3067_s0 + $0x10] sm:$0xff] }
 0x525   :  { %1935 = vpow2.f32 %v1302_v20 }
 0x527   :  { %1414 = vperm.xlu1 %1807, %v1388_v22  }
 0x52a   :  { %v1934_v33 = vpop.eup %1933 }
 0x52b   :  { %v1936_v37 = vpop.eup %1935 }
 0x52c   :  { %v1311_v21 = vadd.f32 %v1936_v37, %v1934_v33 }
 0x52e   :  { %1937 = vrcp.f32 %v1311_v21 }
 0x52f   :  { %v1465_v14 = vpop.permute.xlu1 %1464 }
 0x530   :  { %v1474_v62 = vadd.f32 %v1465_v14, %v2571_v54 }
 0x532   :  { %v1480_v16 = vadd.f32 %v1477_v10, %v1474_v62 }
 0x534   :  { %v1938_v36 = vpop.eup %1937 }
 0x535   :  { %v1391_v60 = vmul.f32 %v1938_v36, %v1936_v37  ;;  %v1327_v42 = vmul.f32 %v1938_v36, %v1934_v33 }
 0x537   :  { %1429 = vperm.xlu1 %1807, %v1391_v60   ;;  %1365 = vperm.xlu0 %1805, %v1327_v42   ;;  %v1467_v9 = vpop.permute.xlu0 %1466 }
 0x538   :  { %v1475_v54 = vadd.f32 %v1467_v9, %v2574_v7 }
 0x53a   :  { %v1481_v23 = vadd.f32 %v1477_v10, %v1475_v54 }
 0x53c   :  { %v2994_v26 = vpop.permute.xlu2 %1340 }
 0x53f   :  { %1810 = vset.pattern.permute.xlu1 %v2156_v46  ;;  %1404 = vperm.xlu0 %1805, %v2974_v32  }
 0x540   :  { %1494 = vperm.xlu1 %1810, %v1480_v16  }
 0x544   :  { %v1463_v56 = vpop.permute.xlu2 %1462  ;;  %v1346_v58 = vpop.permute.xlu1 %1345 }
 0x545   :  { %v1473_v12 = vadd.f32 %v1463_v56, %v2567_v53  ;;  %v1939_v53 = vld [vmem:[%s3067_s0] sm:$0xff]  ;;  %v1371_v7 = vmul.f32 %v1346_v58, %v2769_v18  ;;  %v1941_v18 = vld [vmem:[%s3067_s0 + $0x30] sm:$0xff]  ;;  %v1370_v56 = vmul.f32 %v2994_v26, %v2767_v11 }
 0x546   :  { %v1948_v26 = vld [vmem:[%s3068_s1 + $0x10] sm:$0xff] }
 0x547   :  { %v1479_v1 = vadd.f32 %v1477_v10, %v1473_v12  ;;  %1419 = vperm.xlu0 %1805, %v2979_v30   ;;  %v1376_v30 = vadd.f32 %v1939_v53, %v1368_v45  ;;  %v1379_v19 = vadd.f32 %v1940_v4, %v1371_v7  ;;  %v1378_v54 = vadd.f32 %v1947_v24, %v1370_v56 }
 0x549   :  { %1489 = vperm.xlu2 %1809, %v1479_v1   ;;  %v1946_v1 = vld [vmem:[%s3068_s1 + $0x18] sm:$0xff] }
 0x54f   :  { %1808 = vset.pattern.permute.xlu0 %v2156_v46 }
 0x550   :  { %1484 = vperm.xlu0 %1808, %v1478_v31  }
 0x551   :  { %1499 = vperm.xlu2 %1809, %v1481_v23  }
 0x554   :  { %v3001_v32 = vpop.permute.xlu2 %1355 }
 0x555   :  { %v1373_v45 = vmul.f32 %v3001_v32, %v2781_v13 }
 0x55c   :  { %v1395_v17 = vpop.permute.xlu2 %1394 }
 0x55d   :  { %v1432_v28 = vmul.f32 %v1395_v17, %v2875_v52 }
 0x55f   :  { %v1440_v57 = vadd.f32 %v1432_v28, %v1376_v30 }
 0x561   :  { %1448 = vst [vmem:[#allocation14] sm:$0xff] %v1440_v57 }
 0x564   :  { %v1410_v40 = vpop.permute.xlu2 %1409 }
 0x565   :  { %v1435_v47 = vmul.f32 %v1410_v40, %v2892_v27  ;;  %v1942_v27 = vld [vmem:[%s3067_s0 + $0x8] sm:$0xff] }
 0x566   :  { %v1377_v20 = vadd.f32 %v1942_v27, %v1369_v8 }
 0x567   :  { %v1443_v43 = vadd.f32 %v1435_v47, %v1379_v19 }
 0x569   :  { %1451 = vst [vmem:[#allocation14 + $0x18] sm:$0xff] %v1443_v43 }
 0x571   :  { %v1425_v35 = vpop.permute.xlu2 %1424 }
 0x572   :  { %v1438_v52 = vmul.f32 %v1425_v35, %v2920_v39 }
 0x589   :  { %v1361_v44 = vpop.permute.xlu1 %1360 }
 0x58a   :  { %v1374_v50 = vmul.f32 %v1361_v44, %v2789_v49  ;;  %v1351_v49 = vpop.permute.xlu0 %1350 }
 0x58b   :  { %v1372_v39 = vmul.f32 %v1351_v49, %v2777_v6 }
 0x58c   :  { %v1382_v15 = vadd.f32 %v1941_v18, %v1374_v50 }
 0x58d   :  { %v1380_v21 = vadd.f32 %v1943_v51, %v1372_v39 }
 0x58e   :  { %v1446_v46 = vadd.f32 %v1438_v52, %v1382_v15 }
 0x590   :  { %1454 = vst [vmem:[#allocation14 + $0x30] sm:$0xff] %v1446_v46 }
 0x591   :  { %v1400_v34 = vpop.permute.xlu1 %1399 }
 0x592   :  { %v1433_v22 = vmul.f32 %v1400_v34, %v2880_v41  ;;  %v1944_v41 = vld [vmem:[%s3068_s1 + $0x8] sm:$0xff] }
 0x594   :  { %v1441_v33 = vadd.f32 %v1433_v22, %v1377_v20 }
 0x596   :  { %1449 = vst [vmem:[#allocation14 + $0x8] sm:$0xff] %v1441_v33 }
 0x599   :  { %v1415_v37 = vpop.permute.xlu1 %1414 }
 0x59a   :  { %v1436_v29 = vmul.f32 %v1415_v37, %v2898_v61  ;;  %v1945_v61 = vld [vmem:[%s3067_s0 + $0x38] sm:$0xff] }
 0x59c   :  { %v1444_v36 = vadd.f32 %v1436_v29, %v1380_v21 }
 0x59e   :  { %1452 = vst [vmem:[#allocation14 + $0x20] sm:$0xff] %v1444_v36 }
 0x5a3   :  { %v1490_v2 = vpop.permute.xlu2 %1489 }
 0x5a4   :  { %v1503_v60 = vmul.f32 %v1490_v2, %v2939_v0 }
 0x5a6   :  { %v1507_v42 = vadd.f32 %v1944_v41, %v1503_v60 }
 0x5a8   :  { %1511 = vst [vmem:[#allocation13 + $0x8] sm:$0xff] %v1507_v42 }
 0x5a9   :  { %v1366_v6 = vpop.permute.xlu0 %1365  ;;  %v1430_v14 = vpop.permute.xlu1 %1429 }
 0x5aa   :  { %v1375_v62 = vmul.f32 %v1366_v6, %v2800_v38  ;;  %v1439_v3 = vmul.f32 %v1430_v14, %v2926_v48 }
 0x5ab   :  { %v1500_v10 = vpop.permute.xlu2 %1499 }
 0x5ac   :  { %v1383_v16 = vadd.f32 %v1945_v61, %v1375_v62  ;;  %v1505_v0 = vmul.f32 %v1500_v10, %v2951_v63 }
 0x5ae   :  { %v1447_v12 = vadd.f32 %v1439_v3, %v1383_v16  ;;  %v1509_v9 = vadd.f32 %v1946_v1, %v1505_v0 }
 0x5b0   :  { %1455 = vst [vmem:[#allocation14 + $0x38] sm:$0xff] %v1447_v12 }
 0x5b1   :  { %1513 = vst [vmem:[#allocation13 + $0x18] sm:$0xff] %v1509_v9  ;;  %v1405_v38 = vpop.permute.xlu0 %1404 }
 0x5b2   :  { %v1434_v48 = vmul.f32 %v1405_v38, %v2888_v5  ;;  %v1495_v63 = vpop.permute.xlu1 %1494  ;;  %v1949_v5 = vld [vmem:[%s3067_s0 + $0x28] sm:$0xff] }
 0x5b3   :  { %v1504_v31 = vmul.f32 %v1495_v63, %v2944_v25  ;;  %v1381_v25 = vadd.f32 %v1949_v5, %v1373_v45 }
 0x5b4   :  { %v1442_v11 = vadd.f32 %v1434_v48, %v1378_v54 }
 0x5b5   :  { %v1508_v23 = vadd.f32 %v1948_v26, %v1504_v31 }
 0x5b6   :  { %1450 = vst [vmem:[#allocation14 + $0x10] sm:$0xff] %v1442_v11 }
 0x5b7   :  { %1512 = vst [vmem:[#allocation13 + $0x10] sm:$0xff] %v1508_v23 }
 0x5b9   :  { %v1420_v17 = vpop.permute.xlu0 %1419 }
 0x5ba   :  { %v1437_v53 = vmul.f32 %v1420_v17, %v2906_v59  ;;  %v1950_v59 = vld [vmem:[%s3068_s1] sm:$0xff] }
 0x5bc   :  { %v1445_v30 = vadd.f32 %v1437_v53, %v1381_v25 }
 0x5be   :  { %1453 = vst [vmem:[#allocation14 + $0x28] sm:$0xff] %v1445_v30 }
 0x5bf   :  { %1539 = dma.vmem_to_hbm [thread:$0]  %s1532_s26, 1024, %s1534_s28, [#allocation15], %s2158_s10, %s2158_s10, %s2159_s29  }
 0x5c2   :  { %v1485_v13 = vpop.permute.xlu0 %1484 }
 0x5c3   :  { %v1502_v32 = vmul.f32 %v1485_v13, %v2934_v55 }
 0x5c5   :  { %v1506_v28 = vadd.f32 %v1950_v59, %v1502_v32 }
 0x5c7   :  { %1510 = vst [vmem:[#allocation13] sm:$0xff] %v1506_v28 }
 0x5c8   :  { %1526 = dma.vmem_to_hbm [thread:$0]  %s1519_s30, 512, %s1521_s12, [#allocation4], %s2158_s10, %s2158_s10, %s2159_s29  }
 0x5c9   :  { %2139 = dma.done.wait [#allocation4], 512  }
 0x5ca   :  { %2140 = vsyncadd [#allocation4], 4294966784 }
 0x5cb   :  { %2141 = dma.done.wait [#allocation15], 1024  }
 0x5cc   :  { %2142 = vsyncadd [#allocation15], 4294966272 }
 0x5cd   :  { %1548 = vsyncpa [#allocation3], 1 }
 0x5ce   :  { %1549 = vsyncpa [#allocation7], 1 }
 0x5cf   :  { %1550 = vsyncpa [#allocation10], 1 }
 0x5d0   :  { %1551 = vsyncpa [#allocation4], 1 }
 0x5d1   :  { %1552 = vsyncpa [#allocation15], 1 }
 0x5d2   :  { %1553 = vsyncpa [#allocation5], 1 }

</bundles_post_ra>
